<compile_context>
chip_gen: v7x
topology: tpu7x:2x2x1
jax: 0.10.0
libtpu: 0.0.40
codegen_flags: <defaults>
</compile_context>

<pallas_src>
import functools

import jax
import jax.numpy as jnp
from jax.experimental import pallas as pl
from jax.experimental.pallas import tpu as pltpu

_OUT_PAD = 128  # fc3 matmul padded to a full MXU/lane width (store is 1 col)


def _mlp_kernel(x_ref, w1_ref, b1_ref, w2_ref, b2_ref, w3_ref, b3_ref, o_ref):
    # In-kernel bf16 cast of the f32 x tile (saves a wrapper-side HBM pass).
    x = x_ref[...].astype(jnp.bfloat16)
    # fc1 + relu  (bf16 MXU inputs, f32 accumulate / elementwise)
    h1 = jnp.dot(x, w1_ref[...], preferred_element_type=jnp.float32)
    h1 = jnp.maximum(h1 + b1_ref[...], 0.0)
    # fc2 + relu
    h2 = jnp.dot(h1.astype(jnp.bfloat16), w2_ref[...],
                 preferred_element_type=jnp.float32)
    h2 = jnp.maximum(h2 + b2_ref[...], 0.0)
    # fc3: 128-wide padded matmul for the MXU, but only column 0 is real.
    z = jnp.dot(h2.astype(jnp.bfloat16), w3_ref[...],
                preferred_element_type=jnp.float32)
    z = z[:, :1] + b3_ref[...]          # (tile_b, 1)
    # sigmoid = 1 / (1 + exp(-z)) on the EUP slot (approx recip ~1e-4 rel err)
    o_ref[...] = pl.reciprocal(1.0 + jnp.exp(-z), approx=True)


def _auto_tile_b(B):
    """Pick tile_b.

    Small batches: one tile (block == full dim is always legal; fattest tile is
    best on single-TC v5e/v6e).  Larger batches: the fattest tile <= 2048 rows
    that divides B, is a multiple of 8, and gives an even grid >= 2 so both
    v7x TensorCores get equal work.
    """
    cap = 2048  # ~3 MB f32 x-tile at D_in=384, double-buffered -> far below VMEM limits
    if B < 512 or B % 8:
        return min(B, cap) if B % min(B, cap) == 0 else B
    n = 2
    while n * 8 <= B:
        t = B // n
        if B % n == 0 and t % 8 == 0 and t <= cap:
            return t
        n += 2
    return cap  # ragged fallback (padding path below); never hit in the demo


@functools.partial(jax.jit, static_argnames=("tile_b",))
def discriminator_forward(x, w1, b1, w2, b2, w3, b3, *, tile_b=None):
    """x: (B, input_size) f32.  Returns (B, 1) f32 sigmoid outputs."""
    B, D_in = x.shape
    H1 = w1.shape[1]     # 256
    H2 = w2.shape[1]     # 128
    D_out = w3.shape[1]  # 1

    if tile_b is None:
        tile_b = _auto_tile_b(B)

    # Ragged fallback only (auto tile divides B): pad costs an extra x pass.
    n_tiles = pl.cdiv(B, tile_b)
    B_pad = n_tiles * tile_b
    if B_pad != B:
        x = jnp.pad(x, ((0, B_pad - B), (0, 0)))

    # fc3 weight zero-padded to 128 columns (MXU-friendly); col 0 is the real one.
    w3p = jnp.zeros((H2, _OUT_PAD), w3.dtype).at[:, :D_out].set(w3)

    # bf16 MXU weights (tiny, resident); x stays f32 and is cast in-kernel.
    w1b = w1.astype(jnp.bfloat16)
    w2b = w2.astype(jnp.bfloat16)
    w3b = w3p.astype(jnp.bfloat16)
    b3s = b3.reshape(1, 1).astype(jnp.float32)   # (1, 1) bias for the real column

    # Weights / biases are small and resident for every grid step.
    res = lambda shape: pl.BlockSpec(shape, lambda i: (0, 0))

    flops = 2 * B_pad * (D_in * H1 + H1 * H2 + H2 * _OUT_PAD)
    bytes_accessed = (
        B_pad * D_in * 4                                   # f32 x read
        + w1b.size * 2 + w2b.size * 2 + w3b.size * 2       # bf16 weights
        + b1.size * 4 + b2.size * 4 + b3s.size * 4         # f32 biases
        + B_pad * 1 * 4                                    # (B_pad, 1) f32 out
    )

    out = pl.pallas_call(
        _mlp_kernel,
        out_shape=jax.ShapeDtypeStruct((B_pad, 1), jnp.float32),
        grid_spec=pltpu.PrefetchScalarGridSpec(
            num_scalar_prefetch=0,
            grid=(n_tiles,),
            in_specs=[
                pl.BlockSpec((tile_b, D_in), lambda i: (i, 0)),  # f32 x tile
                res((D_in, H1)),
                res((1, H1)),
                res((H1, H2)),
                res((1, H2)),
                res((H2, _OUT_PAD)),
                res((1, 1)),
            ],
            out_specs=pl.BlockSpec((tile_b, 1), lambda i: (i, 0)),
        ),
        compiler_params=pltpu.CompilerParams(
            dimension_semantics=("parallel",),
        ),
        cost_estimate=pl.CostEstimate(
            flops=flops,
            transcendentals=2 * B_pad,   # exp + recip per row
            bytes_accessed=bytes_accessed,
        ),
    )(x, w1b, b1, w2b, b2, w3b, b3s)

    return out[:B]


def init_linear_params(key, in_features, out_features):
    """PyTorch nn.Linear default init: U(-1/sqrt(fan_in), 1/sqrt(fan_in))."""
    kw, kb = jax.random.split(key)
    bound = 1.0 / jnp.sqrt(jnp.float32(in_features))
    # Stored directly in (in, out) layout (i.e. PyTorch weight transposed).
    w = jax.random.uniform(kw, (in_features, out_features), jnp.float32,
                           minval=-bound, maxval=bound)
    b = jax.random.uniform(kb, (1, out_features), jnp.float32,
                           minval=-bound, maxval=bound)
    return w, b


if __name__ == "__main__":
    # Synthetic mesh sizes (the .obj load is replaced with deterministic small
    # values): num_vertices=64, num_faces=64 -> input_size = 3*(64+64) = 384.
    num_vertices = 64
    num_faces = 64
    input_size = 3 * (num_vertices + num_faces)  # 384
    batch = 512  # auto tile_b=256 -> grid=(2,): both v7x TensorCores get work

    key = jax.random.PRNGKey(0)
    kx, k1, k2, k3 = jax.random.split(key, 4)

    x = jax.random.normal(kx, (batch, input_size), jnp.float32)
    w1, b1 = init_linear_params(k1, input_size, 256)
    w2, b2 = init_linear_params(k2, 256, 128)
    w3, b3 = init_linear_params(k3, 128, 1)

    out = discriminator_forward(x, w1, b1, w2, b2, w3, b3)
    out = jax.block_until_ready(out)

    # Pure-JAX reference with matching bf16 matmul operands / f32 accumulation.
    bf = jnp.bfloat16
    h1 = jnp.maximum(
        jnp.dot(x.astype(bf), w1.astype(bf),
                preferred_element_type=jnp.float32) + b1, 0.0)
    h2 = jnp.maximum(
        jnp.dot(h1.astype(bf), w2.astype(bf),
                preferred_element_type=jnp.float32) + b2, 0.0)
    ref = jax.nn.sigmoid(
        jnp.dot(h2.astype(bf), w3.astype(bf),
                preferred_element_type=jnp.float32) + b3)

    assert out.shape == (batch, 1)
    max_err = float(jnp.max(jnp.abs(out - ref)))
    assert jnp.allclose(out, ref, atol=5e-3, rtol=0.0), max_err

    print("KERNEL_OK")
</pallas_src>

<mosaic_0001>
module attributes {stable_mosaic.version = 11 : i64} {
  func.func @_mlp_kernel(%arg0: i32, %arg1: memref<256x384xf32, #tpu.memory_space<vmem>>, %arg2: memref<384x256xbf16, #tpu.memory_space<vmem>>, %arg3: memref<1x256xf32, #tpu.memory_space<vmem>>, %arg4: memref<256x128xbf16, #tpu.memory_space<vmem>>, %arg5: memref<1x128xf32, #tpu.memory_space<vmem>>, %arg6: memref<128x128xbf16, #tpu.memory_space<vmem>>, %arg7: memref<1x1xf32, #tpu.memory_space<vmem>>, %arg8: memref<256x1xf32, #tpu.memory_space<vmem>>) attributes {dimension_semantics = [#tpu.dimension_semantics<parallel>], iteration_bounds = array<i64: 2>, scalar_prefetch = 0 : i64, scratch_operands = 0 : i64, tpu.core_type = #tpu.core_type<tc>, window_params = [{transform_indices = @transform_0, window_bounds = array<i64: 256, 384>}, {pipeline_mode = #tpu.pipeline_mode<synchronous>, transform_indices = @transform_1, window_bounds = array<i64: 384, 256>}, {pipeline_mode = #tpu.pipeline_mode<synchronous>, transform_indices = @transform_2, window_bounds = array<i64: 1, 256>}, {pipeline_mode = #tpu.pipeline_mode<synchronous>, transform_indices = @transform_3, window_bounds = array<i64: 256, 128>}, {pipeline_mode = #tpu.pipeline_mode<synchronous>, transform_indices = @transform_4, window_bounds = array<i64: 1, 128>}, {pipeline_mode = #tpu.pipeline_mode<synchronous>, transform_indices = @transform_5, window_bounds = array<i64: 128, 128>}, {pipeline_mode = #tpu.pipeline_mode<synchronous>, transform_indices = @transform_6, window_bounds = array<i64: 1, 1>}, {transform_indices = @transform_7, window_bounds = array<i64: 256, 1>}]} {
    %c0 = arith.constant 0 : index
    %c0_0 = arith.constant 0 : index
    %0 = vector.load %arg1[%c0, %c0_0] : memref<256x384xf32, #tpu.memory_space<vmem>>, vector<256x384xf32>
    %1 = arith.truncf %0 : vector<256x384xf32> to vector<256x384xbf16>
    %c0_1 = arith.constant 0 : index
    %c0_2 = arith.constant 0 : index
    %2 = vector.load %arg2[%c0_1, %c0_2] : memref<384x256xbf16, #tpu.memory_space<vmem>>, vector<384x256xbf16>
    %cst = arith.constant dense<0.000000e+00> : vector<256x256xf32>
    %3 = tpu.matmul %1, %2, %cst {dimension_numbers = #tpu.dot_dimension_numbers<[1], [0], [0], [1], [0, 0, 1, 1], [], []>} : vector<256x384xbf16>, vector<384x256xbf16>, vector<256x256xf32> -> vector<256x256xf32>
    %c0_3 = arith.constant 0 : index
    %c0_4 = arith.constant 0 : index
    %4 = vector.load %arg3[%c0_3, %c0_4] : memref<1x256xf32, #tpu.memory_space<vmem>>, vector<1x256xf32>
    %5 = vector.broadcast %4 : vector<1x256xf32> to vector<256x256xf32>
    %6 = arith.addf %3, %5 : vector<256x256xf32>
    %cst_5 = arith.constant 0.000000e+00 : f32
    %7 = vector.broadcast %cst_5 : f32 to vector<256x256xf32>
    %8 = arith.maximumf %6, %7 : vector<256x256xf32>
    %9 = arith.truncf %8 : vector<256x256xf32> to vector<256x256xbf16>
    %c0_6 = arith.constant 0 : index
    %c0_7 = arith.constant 0 : index
    %10 = vector.load %arg4[%c0_6, %c0_7] : memref<256x128xbf16, #tpu.memory_space<vmem>>, vector<256x128xbf16>
    %cst_8 = arith.constant dense<0.000000e+00> : vector<256x128xf32>
    %11 = tpu.matmul %9, %10, %cst_8 {dimension_numbers = #tpu.dot_dimension_numbers<[1], [0], [0], [1], [0, 0, 1, 1], [], []>} : vector<256x256xbf16>, vector<256x128xbf16>, vector<256x128xf32> -> vector<256x128xf32>
    %c0_9 = arith.constant 0 : index
    %c0_10 = arith.constant 0 : index
    %12 = vector.load %arg5[%c0_9, %c0_10] : memref<1x128xf32, #tpu.memory_space<vmem>>, vector<1x128xf32>
    %13 = vector.broadcast %12 : vector<1x128xf32> to vector<256x128xf32>
    %14 = arith.addf %11, %13 : vector<256x128xf32>
    %cst_11 = arith.constant 0.000000e+00 : f32
    %15 = vector.broadcast %cst_11 : f32 to vector<256x128xf32>
    %16 = arith.maximumf %14, %15 : vector<256x128xf32>
    %17 = arith.truncf %16 : vector<256x128xf32> to vector<256x128xbf16>
    %c0_12 = arith.constant 0 : index
    %c0_13 = arith.constant 0 : index
    %18 = vector.load %arg6[%c0_12, %c0_13] : memref<128x128xbf16, #tpu.memory_space<vmem>>, vector<128x128xbf16>
    %cst_14 = arith.constant dense<0.000000e+00> : vector<256x128xf32>
    %19 = tpu.matmul %17, %18, %cst_14 {dimension_numbers = #tpu.dot_dimension_numbers<[1], [0], [0], [1], [0, 0, 1, 1], [], []>} : vector<256x128xbf16>, vector<128x128xbf16>, vector<256x128xf32> -> vector<256x128xf32>
    %20 = vector.extract_strided_slice %19 {offsets = [0, 0], sizes = [256, 1], strides = [1, 1]} : vector<256x128xf32> to vector<256x1xf32>
    %c0_15 = arith.constant 0 : index
    %c0_16 = arith.constant 0 : index
    %21 = vector.load %arg7[%c0_15, %c0_16] : memref<1x1xf32, #tpu.memory_space<vmem>>, vector<1x1xf32>
    %22 = vector.broadcast %21 : vector<1x1xf32> to vector<256x1xf32>
    %23 = arith.addf %20, %22 : vector<256x1xf32>
    %cst_17 = arith.constant 0.000000e+00 : f32
    %24 = vector.broadcast %cst_17 : f32 to vector<256x1xf32>
    %25 = arith.subf %24, %23 : vector<256x1xf32>
    %26 = math.exp %25 : vector<256x1xf32>
    %cst_18 = arith.constant 1.000000e+00 : f32
    %27 = vector.broadcast %cst_18 : f32 to vector<256x1xf32>
    %28 = arith.addf %27, %26 : vector<256x1xf32>
    %29 = tpu.reciprocal %28 {approx = true} : vector<256x1xf32> -> vector<256x1xf32>
    %c0_19 = arith.constant 0 : index
    %c0_20 = arith.constant 0 : index
    %30 = vector.load %arg8[%c0_19, %c0_20] : memref<256x1xf32, #tpu.memory_space<vmem>>, vector<256x1xf32>
    tpu.vector_store %arg8[%c0_19, %c0_20], %29 {strides = array<i32>} : memref<256x1xf32, #tpu.memory_space<vmem>>, vector<256x1xf32>,
    return
  }
  func.func @transform_0(%arg0: i32) -> (i32, i32) {
    %c0_i32 = arith.constant 0 : i32
    %c0_i32_0 = arith.constant 0 : i32
    return %arg0, %c0_i32 : i32, i32
  }
  func.func @transform_1(%arg0: i32) -> (i32, i32) {
    %c0_i32 = arith.constant 0 : i32
    %c0_i32_0 = arith.constant 0 : i32
    %c0_i32_1 = arith.constant 0 : i32
    return %c0_i32, %c0_i32_0 : i32, i32
  }
  func.func @transform_2(%arg0: i32) -> (i32, i32) {
    %c0_i32 = arith.constant 0 : i32
    %c0_i32_0 = arith.constant 0 : i32
    %c0_i32_1 = arith.constant 0 : i32
    return %c0_i32, %c0_i32_0 : i32, i32
  }
  func.func @transform_3(%arg0: i32) -> (i32, i32) {
    %c0_i32 = arith.constant 0 : i32
    %c0_i32_0 = arith.constant 0 : i32
    %c0_i32_1 = arith.constant 0 : i32
    return %c0_i32, %c0_i32_0 : i32, i32
  }
  func.func @transform_4(%arg0: i32) -> (i32, i32) {
    %c0_i32 = arith.constant 0 : i32
    %c0_i32_0 = arith.constant 0 : i32
    %c0_i32_1 = arith.constant 0 : i32
    return %c0_i32, %c0_i32_0 : i32, i32
  }
  func.func @transform_5(%arg0: i32) -> (i32, i32) {
    %c0_i32 = arith.constant 0 : i32
    %c0_i32_0 = arith.constant 0 : i32
    %c0_i32_1 = arith.constant 0 : i32
    return %c0_i32, %c0_i32_0 : i32, i32
  }
  func.func @transform_6(%arg0: i32) -> (i32, i32) {
    %c0_i32 = arith.constant 0 : i32
    %c0_i32_0 = arith.constant 0 : i32
    %c0_i32_1 = arith.constant 0 : i32
    return %c0_i32, %c0_i32_0 : i32, i32
  }
  func.func @transform_7(%arg0: i32) -> (i32, i32) {
    %c0_i32 = arith.constant 0 : i32
    %c0_i32_0 = arith.constant 0 : i32
    return %arg0, %c0_i32 : i32, i32
  }
}

</mosaic_0001>

<bundles_post_ra>
// kernel: discriminator_forward.1
= control target key start
LH: loop header
LB: loop body
LE: loop exit
PB: predicated region body
PF: predicated region fallthrough
CT: control target
= control target key end

     0   :  { %s2770_s26 = smov 0   ;;  %s3477_s0 = inlined_call_operand.vmem [shape: f32[512,384], index: 0, kind: input, shape index: {}]   ;;  %s3478_s1 = inlined_call_operand.vmem [shape: bf16[384,256], index: 1, kind: input, shape index: {}]   ;;  %s3479_s2 = inlined_call_operand.vmem [shape: f32[1,256], index: 2, kind: input, shape index: {}]   ;;  %s3480_s3 = inlined_call_operand.vmem [shape: bf16[256,128], index: 3, kind: input, shape index: {}]   ;;  %s3481_s4 = inlined_call_operand.vmem [shape: f32[1,128], index: 4, kind: input, shape index: {}]   ;;  %s3482_s5 = inlined_call_operand.vmem [shape: bf16[128,128], index: 5, kind: input, shape index: {}]   ;;  %s3483_s6 = inlined_call_operand.<no memory space> [shape: f32[1,1], index: 6, kind: input, shape index: {}]   ;;  %s3484_s7 = inlined_call_operand.vmem [shape: f32[512,1], index: 7, kind: output, shape index: {}]  }
   0x1   :  { %v12_v0 = vstv %s3483_s6 }
   0x2   :  { %13 = vst [vmem:[#allocation2] sm:$0x1] %v12_v0 }
   0x3 LB: > { %s2071_s27 = sadd.s32 4294967295, %s2724_s26   ;;  %p2075_p0 = scmp.ge.s32.totalorder %s2724_s26, 1  ;;  %s2724_s26 = sphi %s2770_s26, %s19_s26  }
   0x4   : > { %p241_p1 = scmp.lt.s32.totalorder %s2724_s26, 3 }
   0x6   : > { %p242_p2 = pnand %p2075_p0, %p241_p1 }
   0x7   : > { %v2494_v1 = vld [vmem:[%s3478_s1 + $0x4] ss:$8 sps:$4 sm:$0xff] (!%p242_p2)   ;;  %v2496_v2 = vld [vmem:[%s3478_s1] ss:$8 sps:$4 sm:$0xff] (!%p242_p2)   ;;  %v2497_v3 = vld [vmem:[%s3478_s1 + $0x14] ss:$8 sps:$4 sm:$0xff] (!%p242_p2)  }
   0x8   : > { %245 = sbr.rel (%p242_p2) target bundleno = 1013 (0x3f5), region = 48  ;;  %732 = vmatprep.subr.bf16.mxu0 (!%p242_p2), %v2494_v1  ;;  %v2499_v4 = vld [vmem:[%s3478_s1 + $0x10] ss:$8 sps:$4 sm:$0xff] (!%p242_p2)   ;;  %s2076_s12 = sshll.u32 (!%p242_p2), %s2071_s27, 5  ;;  %v2500_v5 = vld [vmem:[%s3478_s1 + $0x24] ss:$8 sps:$4 sm:$0xff] (!%p242_p2)  }
   0x9   : > { %733 = vmatpush1.bf16.msra.mxu0 (!%p242_p2), %v2496_v2  ;;  %p275_p3 = scmp.lt.s32.totalorder (!%p242_p2), %s2076_s12, 63  ;;  %v2502_v6 = vld [vmem:[%s3478_s1 + $0x20] ss:$8 sps:$4 sm:$0xff] (!%p242_p2)   ;;  %v2503_v7 = vld [vmem:[%s3478_s1 + $0x34] ss:$8 sps:$4 sm:$0xff] (!%p242_p2)   ;;  %v2726_v13 = vmov (!%p242_p2), 0  }
   0xa   : > { %734 = vmatprep.subr.bf16.mxu0 (!%p242_p2), %v2497_v3  ;;  %v2505_v8 = vld [vmem:[%s3478_s1 + $0x30] ss:$8 sps:$4 sm:$0xff] (!%p242_p2)   ;;  %v2506_v9 = vld [vmem:[%s3478_s1 + $0x44] ss:$8 sps:$4 sm:$0xff] (!%p242_p2)   ;;  %v2508_v10 = vld [vmem:[%s3478_s1 + $0x40] ss:$8 sps:$4 sm:$0xff] (!%p242_p2)   ;;  %1057 = vmatprep.mubr.bf16.mxu1 (!%p242_p2), %v2726_v13 }
   0xb   : > { %v2509_v11 = vld [vmem:[%s3478_s1 + $0x54] ss:$8 sps:$4 sm:$0xff] (!%p242_p2)   ;;  %v2511_v12 = vld [vmem:[%s3478_s1 + $0x50] ss:$8 sps:$4 sm:$0xff] (!%p242_p2)   ;;  %v2512_v14 = vld [vmem:[%s3478_s1 + $0x64] ss:$8 sps:$4 sm:$0xff] (!%p242_p2)  }
   0xc   : > { %v2514_v17 = vld [vmem:[%s3478_s1 + $0x60] ss:$8 sps:$4 sm:$0xff] (!%p242_p2)   ;;  %v2839_v20 = vld [vmem:[%s3478_s1 + $0x104] ss:$8 sps:$4 sm:$0xff] (!%p242_p2)   ;;  %v2515_v21 = vld [vmem:[%s3478_s1 + $0x74] ss:$8 sps:$4 sm:$0xff] (!%p242_p2)  }
   0xd   : > { %735 = vmatpush1.bf16.msra.mxu0 (!%p242_p2), %v2499_v4  ;;  %v2834_v19 = vld [vmem:[%s3478_s1 + $0x100] ss:$8 sps:$4 sm:$0xff] (!%p242_p2)   ;;  %2340 = vmatprep.subr.bf16.mxu1 (!%p242_p2), %v2839_v20  ;;  %v2517_v22 = vld [vmem:[%s3478_s1 + $0x70] ss:$8 sps:$4 sm:$0xff] (!%p242_p2)   ;;  %v2857_v24 = vld [vmem:[%s3478_s1 + $0x114] ss:$8 sps:$4 sm:$0xff] (!%p242_p2)  }
   0xe   : > { %736 = vmatprep.subr.bf16.mxu0 (!%p242_p2), %v2500_v5  ;;  %2348 = vmatpush1.bf16.msra.mxu1 (!%p242_p2), %v2834_v19  ;;  %v2852_v23 = vld [vmem:[%s3478_s1 + $0x110] ss:$8 sps:$4 sm:$0xff] (!%p242_p2)   ;;  %v2518_v25 = vld [vmem:[%s3478_s1 + $0x84] ss:$8 sps:$4 sm:$0xff] (!%p242_p2)   ;;  %v2520_v26 = vld [vmem:[%s3478_s1 + $0x80] ss:$8 sps:$4 sm:$0xff] (!%p242_p2)  }
   0xf   : > { %s3486_s12 = smov (!%p275_p3, %s2076_s12), 63  ;;  %2341 = vmatprep.subr.bf16.mxu1 %v2857_v24  ;;  %v2870_v27 = vld [vmem:[%s3478_s1 + $0x120] ss:$8 sps:$4 sm:$0xff]   ;;  %v2875_v28 = vld [vmem:[%s3478_s1 + $0x124] ss:$8 sps:$4 sm:$0xff]   ;;  %vm1982_vm0 = vcmask 7168  }
  0x10   : > { %s2484_s23 = smul.u32 24, %s3486_s12  ;;  %v2521_v29 = vld [vmem:[%s3478_s1 + $0x94] ss:$8 sps:$4 sm:$0xff]   ;;  %v2523_v30 = vld [vmem:[%s3478_s1 + $0x90] ss:$8 sps:$4 sm:$0xff]   ;;  %s2079_s29 = sshll.u32 %s3486_s12, 3 }
  0x11   : > { %737 = vmatpush1.bf16.msra.mxu0 %v2502_v6  ;;  %v2888_v31 = vld [vmem:[%s3478_s1 + $0x130] ss:$8 sps:$4 sm:$0xff]   ;;  %v2893_v32 = vld [vmem:[%s3478_s1 + $0x134] ss:$8 sps:$4 sm:$0xff]   ;;  %v2524_v33 = vld [vmem:[%s3478_s1 + $0xa4] ss:$8 sps:$4 sm:$0xff]   ;;  %s3384_s9 = scalar_lea.vmem %s3484_s7, %s2079_s29 }
  0x12   : > { %738 = vmatprep.subr.bf16.mxu0 %v2503_v7  ;;  %s2817_s30 = scalar_lea.vmem %s3477_s0, %s2484_s23  ;;  %2349 = vmatpush1.bf16.msra.mxu1 %v2852_v23  ;;  %v2526_v34 = vld [vmem:[%s3478_s1 + $0xa0] ss:$8 sps:$4 sm:$0xff]   ;;  %v2527_v35 = vld [vmem:[%s3478_s1 + $0xb4] ss:$8 sps:$4 sm:$0xff]   ;;  %v2914_v37 = vld [vmem:[%s3478_s1 + $0x144] ss:$8 sps:$4 sm:$0xff]  }
  0x13   : > { %v289_v15 = vld [vmem:[%s2817_s30 + $0x8] sm:$0xff]  ;;  %v292_v16 = vld [vmem:[%s2817_s30 + $0x20] sm:$0xff]  ;;  %2342 = vmatprep.subr.bf16.mxu1 %v2875_v28  ;;  %v2919_v38 = vld [vmem:[%s3478_s1 + $0x154] ss:$8 sps:$4 sm:$0xff]  }
  0x14   : > { %v385_v18 = vpack.c.bf16 %v292_v16, %v289_v15  ;;  %v2909_v36 = vld [vmem:[%s3478_s1 + $0x140] ss:$8 sps:$4 sm:$0xff]   ;;  %v2926_v39 = vld [vmem:[%s3478_s1 + $0x150] ss:$8 sps:$4 sm:$0xff]   ;;  %v2935_v41 = vld [vmem:[%s3478_s1 + $0x164] ss:$8 sps:$4 sm:$0xff]  }
  0x15   : > { %739 = vmatpush1.bf16.msra.mxu0 %v2505_v8  ;;  %v2529_v40 = vld [vmem:[%s3478_s1 + $0xb0] ss:$8 sps:$4 sm:$0xff]   ;;  %v2530_v42 = vld [vmem:[%s3478_s1 + $0xc4] ss:$8 sps:$4 sm:$0xff]   ;;  %v2944_v43 = vld [vmem:[%s3478_s1 + $0x160] ss:$8 sps:$4 sm:$0xff]  }
  0x16   : > { %740 = vmatprep.subr.bf16.mxu0 %v2506_v9  ;;  %764 = vmatprep.mubr.bf16.mxu0 %v385_v18  ;;  %v2532_v44 = vld [vmem:[%s3478_s1 + $0xc0] ss:$8 sps:$4 sm:$0xff]   ;;  %v2953_v45 = vld [vmem:[%s3478_s1 + $0x174] ss:$8 sps:$4 sm:$0xff]   ;;  %v2962_v47 = vld [vmem:[%s3478_s1 + $0x170] ss:$8 sps:$4 sm:$0xff]  }
  0x17   : > { %2350 = vmatpush1.bf16.msra.mxu1 %v2870_v27  ;;  %v2533_v46 = vld [vmem:[%s3478_s1 + $0xd4] ss:$8 sps:$4 sm:$0xff]   ;;  %v353_v49 = vld [vmem:[%s2817_s30 + $0x208] sm:$0xff]  ;;  %v2535_v50 = vld [vmem:[%s3478_s1 + $0xd0] ss:$8 sps:$4 sm:$0xff]  }
  0x18   : > { %2343 = vmatprep.subr.bf16.mxu1 %v2893_v32  ;;  %v350_v48 = vld [vmem:[%s2817_s30 + $0x1f0] sm:$0xff]  ;;  %v2536_v51 = vld [vmem:[%s3478_s1 + $0xe4] ss:$8 sps:$4 sm:$0xff]   ;;  %v2538_v53 = vld [vmem:[%s3478_s1 + $0xe0] ss:$8 sps:$4 sm:$0xff]  }
  0x19   : > { %741 = vmatpush1.bf16.msra.mxu0 %v2508_v10  ;;  %v416_v52 = vpack.c.bf16 %v353_v49, %v350_v48  ;;  %v2539_v54 = vld [vmem:[%s3478_s1 + $0xf4] ss:$8 sps:$4 sm:$0xff]   ;;  %v2541_v55 = vld [vmem:[%s3478_s1 + $0xf0] ss:$8 sps:$4 sm:$0xff]   ;;  %v288_v56 = vld [vmem:[%s2817_s30] sm:$0xff] }
  0x1a   : > { %742 = vmatprep.subr.bf16.mxu0 %v2509_v11  ;;  %v291_v57 = vld [vmem:[%s2817_s30 + $0x18] sm:$0xff]  ;;  %v356_v58 = vld [vmem:[%s2817_s30 + $0x220] sm:$0xff]  ;;  %v298_v61 = vld [vmem:[%s2817_s30 + $0x50] sm:$0xff] }
  0x1b   : > { %2351 = vmatpush1.bf16.msra.mxu1 %v2888_v31  ;;  %v359_v59 = vld [vmem:[%s2817_s30 + $0x238] sm:$0xff]  ;;  %v384_v63 = vpack.c.bf16 %v291_v57, %v288_v56  ;;  %v362_v1 = vld [vmem:[%s2817_s30 + $0x250] sm:$0xff]  ;;  %v365_v2 = vld [vmem:[%s2817_s30 + $0x268] sm:$0xff] }
  0x1c   : > { %2344 = vmatprep.subr.bf16.mxu1 %v2914_v37  ;;  %v295_v60 = vld [vmem:[%s2817_s30 + $0x38] sm:$0xff]  ;;  %v419_v62 = vpack.c.bf16 %v359_v59, %v356_v58  ;;  %v294_v3 = vld [vmem:[%s2817_s30 + $0x30] sm:$0xff]  ;;  %v297_v4 = vld [vmem:[%s2817_s30 + $0x48] sm:$0xff]  ;;  %v422_v7 = vpack.c.bf16 %v365_v2, %v362_v1 }
  0x1d   : > { %743 = vmatpush1.bf16.msra.mxu0 %v2511_v12  ;;  %v388_v0 = vpack.c.bf16 %v298_v61, %v295_v60  ;;  %v301_v5 = vld [vmem:[%s2817_s30 + $0x68] sm:$0xff]  ;;  %v304_v6 = vld [vmem:[%s2817_s30 + $0x80] sm:$0xff]  ;;  %v387_v8 = vpack.c.bf16 %v297_v4, %v294_v3  ;;  %v371_v11 = vld [vmem:[%s2817_s30 + $0x298] sm:$0xff] }
  0x1e   : > { %744 = vmatprep.subr.bf16.mxu0 %v2512_v14  ;;  %v391_v9 = vpack.c.bf16 %v304_v6, %v301_v5  ;;  %v368_v10 = vld [vmem:[%s2817_s30 + $0x280] sm:$0xff]  ;;  %v303_v14 = vld [vmem:[%s2817_s30 + $0x78] sm:$0xff]  ;;  %v310_v16 = vld [vmem:[%s2817_s30 + $0xb0] sm:$0xff] }
  0x1f   : > { %2352 = vmatpush1.bf16.msra.mxu1 %v2909_v36  ;;  %v300_v12 = vld [vmem:[%s2817_s30 + $0x60] sm:$0xff]  ;;  %v307_v15 = vld [vmem:[%s2817_s30 + $0x98] sm:$0xff]  ;;  %v346_v59 = vld [vmem:[%s2817_s30 + $0x1d0] sm:$0xff] }
  0x20   : > { %2345 = vmatprep.subr.bf16.mxu1 %v2919_v38  ;;  %v390_v18 = vpack.c.bf16 %v303_v14, %v300_v12  ;;  %v336_v56 = vld [vmem:[%s2817_s30 + $0x180] sm:$0xff]  ;;  %v339_v57 = vld [vmem:[%s2817_s30 + $0x198] sm:$0xff]  ;;  %v361_v12 = vld [vmem:[%s2817_s30 + $0x248] sm:$0xff] }
  0x21   : > { %745 = vmatpush1.bf16.msra.mxu0 %v2514_v17  ;;  %v425_v17 = vpack.c.bf16 %v371_v11, %v368_v10  ;;  %v343_v58 = vld [vmem:[%s2817_s30 + $0x1b8] sm:$0xff]  ;;  %v408_v60 = vpack.c.bf16 %v339_v57, %v336_v56  ;;  %v352_v1 = vld [vmem:[%s2817_s30 + $0x200] sm:$0xff]  ;;  %v354_v10 = vld [vmem:[%s2817_s30 + $0x210] sm:$0xff] }
  0x22   : > { %746 = vmatprep.subr.bf16.mxu0 %v2515_v21  ;;  %v377_v21 = vld [vmem:[%s2817_s30 + $0x2c8] sm:$0xff]  ;;  %v412_v61 = vpack.c.bf16 %v346_v59, %v343_v58  ;;  %v348_v4 = vld [vmem:[%s2817_s30 + $0x1e0] sm:$0xff]  ;;  %v351_v5 = vld [vmem:[%s2817_s30 + $0x1f8] sm:$0xff] }
  0x23   : > { %2353 = vmatpush1.bf16.msra.mxu1 %v2926_v39  ;;  %v355_v6 = vld [vmem:[%s2817_s30 + $0x218] sm:$0xff]  ;;  %v357_v11 = vld [vmem:[%s2817_s30 + $0x228] sm:$0xff]  ;;  %v364_v14 = vld [vmem:[%s2817_s30 + $0x260] sm:$0xff] }
  0x24   : > { %2346 = vmatprep.subr.bf16.mxu1 %v2935_v41  ;;  %v326_v56 = vld [vmem:[%s2817_s30 + $0x130] sm:$0xff]  ;;  %v329_v57 = vld [vmem:[%s2817_s30 + $0x148] sm:$0xff]  ;;  %v332_v59 = vld [vmem:[%s2817_s30 + $0x160] sm:$0xff] }
  0x25   : > { %747 = vmatpush1.bf16.msra.mxu0 %v2517_v22  ;;  %v306_v22 = vld [vmem:[%s2817_s30 + $0x90] sm:$0xff]  ;;  %v404_v58 = vpack.c.bf16 %v329_v57, %v326_v56 }
  0x26   : > { %748 = vmatprep.subr.bf16.mxu0 %v2518_v25  ;;  %v316_v25 = vld [vmem:[%s2817_s30 + $0xe0] sm:$0xff] }
  0x27   : > { %2354 = vmatpush1.bf16.msra.mxu1 %v2944_v43 }
  0x28   : > { %2347 = vmatprep.subr.bf16.mxu1 %v2953_v45 }
  0x29   : > { %749 = vmatpush1.bf16.msra.mxu0 %v2520_v26 }
  0x2a   : > { %750 = vmatprep.subr.bf16.mxu0 %v2521_v29  ;;  %v380_v29 = vld [vmem:[%s2817_s30 + $0x2e0] sm:$0xff] }
  0x2b   : > { %2355 = vmatpush1.bf16.msra.mxu1 %v2962_v47 }
  0x2d   : > { %751 = vmatpush1.bf16.msra.mxu0 %v2523_v30  ;;  %v383_v30 = vld [vmem:[%s2817_s30 + $0x2f8] sm:$0xff] }
  0x2e   : > { %752 = vmatprep.subr.bf16.mxu0 %v2524_v33  ;;  %1058 = vmatmul.mubr.bf16.vlgmr.msra.gmra.mrb[0].mxu1 %v416_v52  ;;  %v319_v33 = vld [vmem:[%s2817_s30 + $0xf8] sm:$0xff]  ;;  %v337_v52 = vld [vmem:[%s2817_s30 + $0x188] sm:$0xff] }
  0x2f   : > { %1067 = vmatprep.mubr.bf16.mxu1 %v2726_v13 }
  0x31   : > { %753 = vmatpush1.bf16.msra.mxu0 %v2526_v34  ;;  %v322_v34 = vld [vmem:[%s2817_s30 + $0x110] sm:$0xff] }
  0x32   : > { %754 = vmatprep.subr.bf16.mxu0 %v2527_v35  ;;  %v431_v35 = vpack.c.bf16 %v383_v30, %v380_v29  ;;  %v372_v29 = vld [vmem:[%s2817_s30 + $0x2a0] sm:$0xff]  ;;  %v375_v30 = vld [vmem:[%s2817_s30 + $0x2b8] sm:$0xff] }
  0x35   : > { %755 = vmatpush1.bf16.msra.mxu0 %v2529_v40  ;;  %v325_v40 = vld [vmem:[%s2817_s30 + $0x128] sm:$0xff] }
  0x36   : > { %756 = vmatprep.subr.bf16.mxu0 %v2530_v42  ;;  %1068 = vmatmul.mubr.bf16.gmra.mrb[4].mxu1 %v419_v62  ;;  %v342_v62 = vld [vmem:[%s2817_s30 + $0x1b0] sm:$0xff] }
  0x37   : > { %1077 = vmatprep.mubr.bf16.mxu1 %v2726_v13 }
  0x39   : > { %757 = vmatpush1.bf16.msra.mxu0 %v2532_v44  ;;  %v324_v44 = vld [vmem:[%s2817_s30 + $0x120] sm:$0xff] }
  0x3a   : > { %758 = vmatprep.subr.bf16.mxu0 %v2533_v46  ;;  %v331_v46 = vld [vmem:[%s2817_s30 + $0x158] sm:$0xff] }
  0x3d   : > { %759 = vmatpush1.bf16.msra.mxu0 %v2535_v50  ;;  %v330_v50 = vld [vmem:[%s2817_s30 + $0x150] sm:$0xff] }
  0x3e   : > { %760 = vmatprep.subr.bf16.mxu0 %v2536_v51  ;;  %1078 = vmatmul.mubr.bf16.gmra.mrb[8].mxu1 %v422_v7  ;;  %v333_v51 = vld [vmem:[%s2817_s30 + $0x168] sm:$0xff]  ;;  %v358_v7 = vld [vmem:[%s2817_s30 + $0x230] sm:$0xff] }
  0x3f   : > { %1087 = vmatprep.mubr.bf16.mxu1 %v2726_v13 }
  0x41   : > { %761 = vmatpush1.bf16.msra.mxu0 %v2538_v53  ;;  %v340_v53 = vld [vmem:[%s2817_s30 + $0x1a0] sm:$0xff] }
  0x42   : > { %762 = vmatprep.subr.bf16.mxu0 %v2539_v54  ;;  %v405_v54 = vpack.c.bf16 %v333_v51, %v330_v50  ;;  %v314_v50 = vld [vmem:[%s2817_s30 + $0xd0] sm:$0xff]  ;;  %v317_v51 = vld [vmem:[%s2817_s30 + $0xe8] sm:$0xff] }
  0x45   : > { %763 = vmatpush1.bf16.msra.mxu0 %v2541_v55  ;;  %v409_v55 = vpack.c.bf16 %v340_v53, %v337_v52  ;;  %v398_v52 = vpack.c.bf16 %v317_v51, %v314_v50  ;;  %v320_v53 = vld [vmem:[%s2817_s30 + $0x100] sm:$0xff] }
  0x46   : > { %925 = vmatprep.subr.bf16.mxu0 %v2839_v20  ;;  %1088 = vmatmul.mubr.bf16.gmra.mrb[12].mxu1 %v425_v17  ;;  %v374_v20 = vld [vmem:[%s2817_s30 + $0x2b0] sm:$0xff]  ;;  %v360_v17 = vld [vmem:[%s2817_s30 + $0x240] sm:$0xff] }
  0x47   : > { %1097 = vmatprep.mubr.bf16.mxu1 %v2726_v13  ;;  %v428_v26 = vpack.c.bf16 %v377_v21, %v374_v20  ;;  %v370_v20 = vld [vmem:[%s2817_s30 + $0x290] sm:$0xff] }
  0x48   : > { %765 = vmatmul.mubr.bf16.vlgmr.msra.gmra.mrb[0].mxu0 %v384_v63  ;;  %v345_v63 = vld [vmem:[%s2817_s30 + $0x1c8] sm:$0xff] }
  0x49   : > { %926 = vmatpush1.bf16.msra.mxu0 %v2834_v19  ;;  %774 = vmatprep.mubr.bf16.mxu0 %v388_v0  ;;  %v394_v19 = vpack.c.bf16 %v310_v16, %v307_v15  ;;  %v349_v0 = vld [vmem:[%s2817_s30 + $0x1e8] sm:$0xff]  ;;  %v411_v2 = vpack.c.bf16 %v345_v63, %v342_v62  ;;  %v417_v15 = vpack.c.bf16 %v357_v11, %v354_v10  ;;  %v2567_v63 = vld [vmem:[%s3480_s3] sm:$0xff]   ;;  %v2572_v10 = vld [vmem:[%s3480_s3 + $0x58] sm:$0xff]  }
  0x4a   : > { %927 = vmatprep.subr.bf16.mxu0 %v2857_v24  ;;  %v313_v24 = vld [vmem:[%s2817_s30 + $0xc8] sm:$0xff]  ;;  %v415_v3 = vpack.c.bf16 %v352_v1, %v349_v0  ;;  %v421_v16 = vpack.c.bf16 %v364_v14, %v361_v12  ;;  %v2573_v11 = vld [vmem:[%s3480_s3 + $0x18] sm:$0xff]   ;;  %v2574_v12 = vld [vmem:[%s3480_s3 + $0x60] sm:$0xff]  }
  0x4b   : > { %v2568_v0 = vld [vmem:[%s3480_s3 + $0x48] sm:$0xff]  }
  0x4c   : > { %v2569_v1 = vld [vmem:[%s3480_s3 + $0x8] sm:$0xff]  }
  0x4d   : > { %928 = vmatpush1.bf16.msra.mxu0 %v2852_v23  ;;  %v309_v23 = vld [vmem:[%s2817_s30 + $0xa8] sm:$0xff] }
  0x4e   : > { %929 = vmatprep.subr.bf16.mxu0 %v2875_v28  ;;  %v397_v28 = vpack.c.bf16 %v316_v25, %v313_v24  ;;  %1098 = vmatmul.mubr.bf16.gmra.mrb[16].mxu1 %v428_v26  ;;  %v369_v24 = vld [vmem:[%s2817_s30 + $0x288] sm:$0xff]  ;;  %v376_v26 = vld [vmem:[%s2817_s30 + $0x2c0] sm:$0xff] }
  0x4f   : > { %1107 = vmatprep.mubr.bf16.mxu1 %v2726_v13  ;;  %v373_v25 = vld [vmem:[%s2817_s30 + $0x2a8] sm:$0xff] }
  0x50   : > { %775 = vmatmul.mubr.bf16.gmra.mrb[4].mxu0 %v387_v8  ;;  %v414_v8 = vpack.c.bf16 %v351_v5, %v348_v4  ;;  %v2570_v5 = vld [vmem:[%s3480_s3 + $0x50] sm:$0xff]  }
  0x51   : > { %784 = vmatprep.mubr.bf16.mxu0 %v391_v9  ;;  %930 = vmatpush1.bf16.msra.mxu0 %v2870_v27  ;;  %v393_v27 = vpack.c.bf16 %v309_v23, %v306_v22  ;;  %v418_v9 = vpack.c.bf16 %v358_v7, %v355_v6  ;;  %v366_v23 = vld [vmem:[%s2817_s30 + $0x270] sm:$0xff]  ;;  %v344_v7 = vld [vmem:[%s2817_s30 + $0x1c0] sm:$0xff] }
  0x52   : > { %931 = vmatprep.subr.bf16.mxu0 %v2893_v32  ;;  %v315_v32 = vld [vmem:[%s2817_s30 + $0xd8] sm:$0xff]  ;;  %v2571_v6 = vld [vmem:[%s3480_s3 + $0x10] sm:$0xff]  }
  0x55   : > { %932 = vmatpush1.bf16.msra.mxu0 %v2888_v31  ;;  %v312_v31 = vld [vmem:[%s2817_s30 + $0xc0] sm:$0xff] }
  0x56   : > { %933 = vmatprep.subr.bf16.mxu0 %v2914_v37  ;;  %v400_v37 = vpack.c.bf16 %v322_v34, %v319_v33  ;;  %1108 = vmatmul.mubr.bf16.gmra.mrb[20].mxu1 %v431_v35  ;;  %v426_v33 = vpack.c.bf16 %v375_v30, %v372_v29  ;;  %v378_v35 = vld [vmem:[%s2817_s30 + $0x2d0] sm:$0xff] }
  0x58   : > { %785 = vmatmul.mubr.bf16.gmra.mrb[8].mxu0 %v390_v18  ;;  %v363_v18 = vld [vmem:[%s2817_s30 + $0x258] sm:$0xff] }
  0x59   : > { %794 = vmatprep.mubr.bf16.mxu0 %v394_v19  ;;  %934 = vmatpush1.bf16.msra.mxu0 %v2909_v36  ;;  %v396_v36 = vpack.c.bf16 %v315_v32, %v312_v31  ;;  %v367_v19 = vld [vmem:[%s2817_s30 + $0x278] sm:$0xff]  ;;  %v420_v21 = vpack.c.bf16 %v363_v18, %v360_v17  ;;  %v382_v32 = vld [vmem:[%s2817_s30 + $0x2f0] sm:$0xff]  ;;  %v2576_v18 = vld [vmem:[%s3480_s3 + $0x68] sm:$0xff]  }
  0x5a   : > { %935 = vmatprep.subr.bf16.mxu0 %v2919_v38  ;;  %v318_v38 = vld [vmem:[%s2817_s30 + $0xf0] sm:$0xff]  ;;  %v424_v22 = vpack.c.bf16 %v370_v20, %v367_v19  ;;  %v379_v31 = vld [vmem:[%s2817_s30 + $0x2d8] sm:$0xff]  ;;  %v2577_v19 = vld [vmem:[%s3480_s3 + $0x28] sm:$0xff]  }
  0x5b   : > { %v430_v34 = vpack.c.bf16 %v382_v32, %v379_v31 }
  0x5d   : > { %936 = vmatpush1.bf16.msra.mxu0 %v2926_v39  ;;  %v321_v39 = vld [vmem:[%s2817_s30 + $0x108] sm:$0xff] }
  0x5e   : > { %937 = vmatprep.subr.bf16.mxu0 %v2935_v41  ;;  %v328_v41 = vld [vmem:[%s2817_s30 + $0x140] sm:$0xff]  ;;  %v399_v42 = vpack.c.bf16 %v321_v39, %v318_v38  ;;  %v290_v38 = vld [vmem:[%s2817_s30 + $0x10] sm:$0xff]  ;;  %v293_v39 = vld [vmem:[%s2817_s30 + $0x28] sm:$0xff] }
  0x60   : > { %795 = vmatmul.mubr.bf16.gmra.mrb[12].mxu0 %v393_v27  ;;  %v423_v27 = vpack.c.bf16 %v369_v24, %v366_v23  ;;  %v2578_v23 = vld [vmem:[%s3480_s3 + $0x70] sm:$0xff]  }
  0x61   : > { %804 = vmatprep.mubr.bf16.mxu0 %v397_v28  ;;  %938 = vmatpush1.bf16.msra.mxu0 %v2944_v43  ;;  %v403_v43 = vpack.c.bf16 %v328_v41, %v325_v40  ;;  %v427_v28 = vpack.c.bf16 %v376_v26, %v373_v25  ;;  %v386_v40 = vpack.c.bf16 %v293_v39, %v290_v38  ;;  %v296_v41 = vld [vmem:[%s2817_s30 + $0x40] sm:$0xff]  ;;  %v2579_v25 = vld [vmem:[%s3480_s3 + $0x30] sm:$0xff]   ;;  %v2580_v26 = vld [vmem:[%s3480_s3 + $0x78] sm:$0xff]  }
  0x62   : > { %939 = vmatprep.subr.bf16.mxu0 %v2953_v45  ;;  %v327_v45 = vld [vmem:[%s2817_s30 + $0x138] sm:$0xff] }
  0x63   : > { %v402_v48 = vpack.c.bf16 %v327_v45, %v324_v44  ;;  %v302_v44 = vld [vmem:[%s2817_s30 + $0x70] sm:$0xff]  ;;  %v305_v45 = vld [vmem:[%s2817_s30 + $0x88] sm:$0xff] }
  0x65   : > { %940 = vmatpush1.bf16.msra.mxu0 %v2962_v47  ;;  %v334_v47 = vld [vmem:[%s2817_s30 + $0x170] sm:$0xff] }
  0x66   : > { %v406_v49 = vpack.c.bf16 %v334_v47, %v331_v46  ;;  %v392_v46 = vpack.c.bf16 %v305_v45, %v302_v44  ;;  %v308_v47 = vld [vmem:[%s2817_s30 + $0xa0] sm:$0xff]  ;;  %v482_v44 = vlaneseq }
  0x68   : > { %805 = vmatmul.mubr.bf16.gmra.mrb[16].mxu0 %v396_v36  ;;  %v381_v36 = vld [vmem:[%s2817_s30 + $0x2e8] sm:$0xff]  ;;  %v483_v45 = vshrl.u32 %v482_v44, 7 }
  0x69   : > { %814 = vmatprep.mubr.bf16.mxu0 %v400_v37  ;;  %v429_v37 = vpack.c.bf16 %v381_v36, %v378_v35 }
  0x70   : > { %815 = vmatmul.mubr.bf16.gmra.mrb[20].mxu0 %v399_v42  ;;  %v299_v42 = vld [vmem:[%s2817_s30 + $0x58] sm:$0xff] }
  0x71   : > { %824 = vmatprep.mubr.bf16.mxu0 %v403_v43  ;;  %v389_v43 = vpack.c.bf16 %v299_v42, %v296_v41 }
  0x78   : > { %825 = vmatmul.mubr.bf16.gmra.mrb[24].mxu0 %v402_v48  ;;  %v311_v48 = vld [vmem:[%s2817_s30 + $0xb8] sm:$0xff] }
  0x79   : > { %834 = vmatprep.mubr.bf16.mxu0 %v406_v49  ;;  %v395_v49 = vpack.c.bf16 %v311_v48, %v308_v47  ;;  %v480_v47 = vld [vmem:[%s3479_s2] sm:$0x3]  ;;  %v488_v48 = vsub.s32 1, %v483_v45 }
  0x7b   : > { %v3191_v50 = vrot.slane %v480_v47, %v488_v48 }
  0x80   : > { %835 = vmatmul.mubr.bf16.gmra.mrb[28].mxu0 %v405_v54  ;;  %v323_v54 = vld [vmem:[%s2817_s30 + $0x118] sm:$0xff] }
  0x81   : > { %844 = vmatprep.mubr.bf16.mxu0 %v409_v55  ;;  %v401_v55 = vpack.c.bf16 %v323_v54, %v320_v53 }
  0x88   : > { %845 = vmatmul.mubr.bf16.gmra.mrb[32].mxu0 %v408_v60  ;;  %v335_v60 = vld [vmem:[%s2817_s30 + $0x178] sm:$0xff] }
  0x89   : > { %854 = vmatprep.mubr.bf16.mxu0 %v412_v61  ;;  %v2566_v61 = vld [vmem:[%s3480_s3 + $0x40] sm:$0xff]   ;;  %v407_v62 = vpack.c.bf16 %v335_v60, %v332_v59 }
  0x8a   : > { %2156 = vmatprep.subr.bf16.mxu1 %v2566_v61 }
  0x8b   : > { %2157 = vmatpush3.bf16.msra.mxu1 %v2567_v63 }
  0x8c   : > { %2158 = vmatprep.subr.bf16.mxu1 %v2568_v0 }
  0x8f   : > { %2159 = vmatpush3.bf16.msra.mxu1 %v2569_v1 }
  0x90   : > { %855 = vmatmul.mubr.bf16.gmra.mrb[36].mxu0 %v411_v2  ;;  %v338_v2 = vld [vmem:[%s2817_s30 + $0x190] sm:$0xff]  ;;  %2160 = vmatprep.subr.bf16.mxu1 %v2570_v5 }
  0x91   : > { %864 = vmatprep.mubr.bf16.mxu0 %v415_v3  ;;  %v341_v3 = vld [vmem:[%s2817_s30 + $0x1a8] sm:$0xff] }
  0x92   : > { %v410_v4 = vpack.c.bf16 %v341_v3, %v338_v2 }
  0x93   : > { %2161 = vmatpush3.bf16.msra.mxu1 %v2571_v6 }
  0x94   : > { %2162 = vmatprep.subr.bf16.mxu1 %v2572_v10 }
  0x97   : > { %2163 = vmatpush3.bf16.msra.mxu1 %v2573_v11 }
  0x98   : > { %865 = vmatmul.mubr.bf16.gmra.mrb[40].mxu0 %v414_v8  ;;  %v347_v8 = vld [vmem:[%s2817_s30 + $0x1d8] sm:$0xff]  ;;  %2164 = vmatprep.subr.bf16.mxu1 %v2574_v12 }
  0x99   : > { %874 = vmatprep.mubr.bf16.mxu0 %v418_v9  ;;  %v413_v9 = vpack.c.bf16 %v347_v8, %v344_v7 }
  0xa0   : > { %875 = vmatmul.mubr.bf16.gmra.mrb[44].mxu0 %v417_v15 }
  0xa1   : > { %884 = vmatprep.mubr.bf16.mxu0 %v421_v16  ;;  %v2575_v16 = vld [vmem:[%s3480_s3 + $0x20] sm:$0xff]  }
  0xa2   : > { %2165 = vmatpush3.bf16.msra.mxu1 %v2575_v16 }
  0xa3   : > { %2166 = vmatprep.subr.bf16.mxu1 %v2576_v18 }
  0xa6   : > { %2167 = vmatpush3.bf16.msra.mxu1 %v2577_v19 }
  0xa7   : > { %2168 = vmatprep.subr.bf16.mxu1 %v2578_v23 }
  0xa8   : > { %885 = vmatmul.mubr.bf16.gmra.mrb[48].mxu0 %v420_v21 }
  0xa9   : > { %894 = vmatprep.mubr.bf16.mxu0 %v424_v22 }
  0xaa   : > { %2169 = vmatpush3.bf16.msra.mxu1 %v2579_v25 }
  0xab   : > { %2170 = vmatprep.subr.bf16.mxu1 %v2580_v26 }
  0xb0   : > { %895 = vmatmul.mubr.bf16.gmra.mrb[52].mxu0 %v423_v27  ;;  %v2581_v27 = vld [vmem:[%s3480_s3 + $0x38] sm:$0xff]  }
  0xb1   : > { %904 = vmatprep.mubr.bf16.mxu0 %v427_v28  ;;  %2171 = vmatpush3.bf16.msra.mxu1 %v2581_v27 }
  0xb8   : > { %905 = vmatmul.mubr.bf16.gmra.mrb[56].mxu0 %v426_v33 }
  0xb9   : > { %914 = vmatprep.mubr.bf16.mxu0 %v430_v34 }
  0xc0   : > { %915 = vmatmul.mubr.bf16.gmra.mrb[60].mxu0 %v429_v37 }
  0xc1   : > { %957 = vmatprep.mubr.bf16.mxu0 %v2726_v13 }
  0xc8   : > { %958 = vmatmul.mubr.bf16.vlgmr.msra.gmra.mrb[0].mxu0 %v386_v40 }
  0xc9   : > { %967 = vmatprep.mubr.bf16.mxu0 %v2726_v13 }
  0xd0   : > { %968 = vmatmul.mubr.bf16.gmra.mrb[4].mxu0 %v389_v43 }
  0xd1   : > { %977 = vmatprep.mubr.bf16.mxu0 %v2726_v13 }
  0xd8   : > { %978 = vmatmul.mubr.bf16.gmra.mrb[8].mxu0 %v392_v46  ;;  %v484_v46 = vsub.s32 0, %v483_v45 }
  0xd9   : > { %987 = vmatprep.mubr.bf16.mxu0 %v2726_v13 }
  0xe0   : > { %988 = vmatmul.mubr.bf16.gmra.mrb[12].mxu0 %v395_v49  ;;  %v3189_v49 = vrot.slane %v480_v47, %v484_v46 }
  0xe1   : > { %997 = vmatprep.mubr.bf16.mxu0 %v2726_v13 }
  0xe8   : > { %998 = vmatmul.mubr.bf16.gmra.mrb[16].mxu0 %v398_v52 }
  0xe9   : > { %1007 = vmatprep.mubr.bf16.mxu0 %v2726_v13 }
  0xf0   : > { %1008 = vmatmul.mubr.bf16.gmra.mrb[20].mxu0 %v401_v55 }
  0xf1   : > { %1017 = vmatprep.mubr.bf16.mxu0 %v2726_v13 }
  0xf8   : > { %1018 = vmatmul.mubr.bf16.gmra.mrb[24].mxu0 %v404_v58 }
  0xf9   : > { %1027 = vmatprep.mubr.bf16.mxu0 %v2726_v13 }
 0x100   : > { %1028 = vmatmul.mubr.bf16.gmra.mrb[28].mxu0 %v407_v62 }
 0x101   : > { %1037 = vmatprep.mubr.bf16.mxu0 %v2726_v13  ;;  %v1059_v14 = vpop.f32.mrb[0].mxu1 }
 0x108   : > { %1038 = vmatmul.mubr.bf16.gmra.mrb[32].mxu0 %v410_v4 }
 0x109   : > { %1047 = vmatprep.mubr.bf16.mxu0 %v2726_v13  ;;  %v1061_v13 = vpop.f32.mrb[1].mxu1 }
 0x10a   : > { %v1063_v15 = vpop.f32.mrb[2].mxu1 }
 0x10b   : > { %v1065_v17 = vpop.f32.mrb[3].mxu1 }
 0x10c   : > { %v1069_v20 = vpop.f32.mrb[4].mxu1 }
 0x10d   : > { %v1071_v21 = vpop.f32.mrb[5].mxu1 }
 0x10e   : > { %v1073_v22 = vpop.f32.mrb[6].mxu1 }
 0x10f   : > { %v1075_v24 = vpop.f32.mrb[7].mxu1 }
 0x110   : > { %1048 = vmatmul.mubr.bf16.gmra.mrb[36].mxu0 %v413_v9 }
 0x111   : > { %v3154_v28 = vpop.f32.mrb[8].mxu1 }
 0x112   : > { %v3156_v29 = vpop.f32.mrb[9].mxu1 }
 0x113   : > { %v3158_v30 = vpop.f32.mrb[10].mxu1 }
 0x114   : > { %v3160_v31 = vpop.f32.mrb[11].mxu1 }
 0x119   : > { %v3162_v32 = vpop.f32.mrb[12].mxu1 }
 0x11a   : > { %v3164_v33 = vpop.f32.mrb[13].mxu1 }
 0x11b   : > { %v3166_v34 = vpop.f32.mrb[14].mxu1 }
 0x11c   : > { %v3168_v35 = vpop.f32.mrb[15].mxu1 }
 0x121   : > { %v3170_v36 = vpop.f32.mrb[16].mxu1 }
 0x122   : > { %v3172_v37 = vpop.f32.mrb[17].mxu1 }
 0x123   : > { %v3174_v38 = vpop.f32.mrb[18].mxu1 }
 0x124   : > { %v3176_v39 = vpop.f32.mrb[19].mxu1 }
 0x129   : > { %v3178_v40 = vpop.f32.mrb[20].mxu1 }
 0x12a   : > { %v3180_v41 = vpop.f32.mrb[21].mxu1 }
 0x12b   : > { %v3182_v42 = vpop.f32.mrb[22].mxu1 }
 0x12c   : > { %v3184_v43 = vpop.f32.mrb[23].mxu1 }
 0x16b   : > { %v866_v51 = vpop.f32.mrb[40].mxu0 }
 0x16c   : > { %v867_v52 = vadd.f32 %v866_v51, %v3189_v49  ;;  %v868_v53 = vpop.f32.mrb[41].mxu0 }
 0x16d   : > { %v869_v54 = vadd.f32 %v868_v53, %v3191_v50  ;;  %v870_v55 = vpop.f32.mrb[42].mxu0 }
 0x16e   : > { %v871_v56 = vadd.f32 %v870_v55, %v3189_v49  ;;  %v1060_v57 = vadd.f32 %v1059_v14, %v867_v52  ;;  %v872_v58 = vpop.f32.mrb[43].mxu0 }
 0x16f   : > { %v873_v59 = vadd.f32 %v872_v58, %v3191_v50  ;;  %v1062_v60 = vadd.f32 %v1061_v13, %v869_v54 }
 0x170   : > { %v1064_v61 = vadd.f32 %v1063_v15, %v871_v56  ;;  %v1158_v63 = vmax.f32 %v1060_v57, 0.0 }
 0x171   : > { %v1066_v62 = vadd.f32 %v1065_v17, %v873_v59  ;;  %v1159_v1 = vmax.f32 %v1062_v60, 0.0 }
 0x172   : > { %v1160_v0 = vmax.f32 %v1064_v61, 0.0 }
 0x173   : > { %v1161_v2 = vmax.f32 %v1066_v62, 0.0  ;;  %v876_v3 = vpop.f32.mrb[44].mxu0 }
 0x174   : > { %v3197_v4 = vpack.c.bf16 %v1160_v0, %v1158_v63  ;;  %v877_v5 = vadd.f32 %v876_v3, %v3189_v49  ;;  %v878_v6 = vpop.f32.mrb[45].mxu0 }
 0x175   : > { %v3200_v7 = vpack.c.bf16 %v1161_v2, %v1159_v1  ;;  %v879_v8 = vadd.f32 %v878_v6, %v3191_v50  ;;  %v880_v9 = vpop.f32.mrb[46].mxu0 }
 0x176   : > { %v881_v10 = vadd.f32 %v880_v9, %v3189_v49  ;;  %v1070_v11 = vadd.f32 %v1069_v20, %v877_v5  ;;  %v882_v12 = vpop.f32.mrb[47].mxu0 }
 0x177   : > { %v883_v14 = vadd.f32 %v882_v12, %v3191_v50  ;;  %v1072_v13 = vadd.f32 %v1071_v21, %v879_v8 }
 0x178   : > { %v1074_v15 = vadd.f32 %v1073_v22, %v881_v10  ;;  %v1162_v17 = vmax.f32 %v1070_v11, 0.0 }
 0x179   : > { %v1076_v16 = vadd.f32 %v1075_v24, %v883_v14  ;;  %v1163_v19 = vmax.f32 %v1072_v13, 0.0 }
 0x17a   : > { %v1164_v18 = vmax.f32 %v1074_v15, 0.0 }
 0x17b   : > { %v1165_v23 = vmax.f32 %v1076_v16, 0.0  ;;  %v886_v25 = vpop.f32.mrb[48].mxu0 }
 0x17c   : > { %v3205_v26 = vpack.c.bf16 %v1164_v18, %v1162_v17  ;;  %v887_v27 = vadd.f32 %v886_v25, %v3189_v49  ;;  %v888_v44 = vpop.f32.mrb[49].mxu0 }
 0x17d   : > { %v3208_v45 = vpack.c.bf16 %v1165_v23, %v1163_v19  ;;  %v889_v20 = vadd.f32 %v888_v44, %v3191_v50  ;;  %v890_v46 = vpop.f32.mrb[50].mxu0 }
 0x17e   : > { %v891_v47 = vadd.f32 %v890_v46, %v3189_v49  ;;  %v1080_v21 = vadd.f32 %v3154_v28, %v887_v27  ;;  %v892_v22 = vpop.f32.mrb[51].mxu0 }
 0x17f   : > { %v893_v24 = vadd.f32 %v892_v22, %v3191_v50  ;;  %v1082_v48 = vadd.f32 %v3156_v29, %v889_v20 }
 0x180   : > { %v1084_v51 = vadd.f32 %v3158_v30, %v891_v47  ;;  %v1166_v53 = vmax.f32 %v1080_v21, 0.0 }
 0x181   : > { %v1086_v52 = vadd.f32 %v3160_v31, %v893_v24  ;;  %v1167_v55 = vmax.f32 %v1082_v48, 0.0 }
 0x182   : > { %v1168_v54 = vmax.f32 %v1084_v51, 0.0 }
 0x183   : > { %v1169_v56 = vmax.f32 %v1086_v52, 0.0  ;;  %v896_v57 = vpop.f32.mrb[52].mxu0 }
 0x184   : > { %v3217_v58 = vpack.c.bf16 %v1168_v54, %v1166_v53  ;;  %v897_v59 = vadd.f32 %v896_v57, %v3189_v49  ;;  %v898_v60 = vpop.f32.mrb[53].mxu0 }
 0x185   : > { %v3220_v28 = vpack.c.bf16 %v1169_v56, %v1167_v55  ;;  %v899_v61 = vadd.f32 %v898_v60, %v3191_v50  ;;  %v900_v62 = vpop.f32.mrb[54].mxu0 }
 0x186   : > { %v901_v29 = vadd.f32 %v900_v62, %v3189_v49  ;;  %v1090_v30 = vadd.f32 %v3162_v32, %v897_v59  ;;  %v902_v31 = vpop.f32.mrb[55].mxu0 }
 0x187   : > { %v903_v63 = vadd.f32 %v902_v31, %v3191_v50  ;;  %v1092_v0 = vadd.f32 %v3164_v33, %v899_v61 }
 0x188   : > { %v1094_v1 = vadd.f32 %v3166_v34, %v901_v29  ;;  %v1170_v3 = vmax.f32 %v1090_v30, 0.0 }
 0x189   : > { %v1096_v2 = vadd.f32 %v3168_v35, %v903_v63  ;;  %v1171_v6 = vmax.f32 %v1092_v0, 0.0 }
 0x18a   : > { %v1172_v5 = vmax.f32 %v1094_v1, 0.0 }
 0x18b   : > { %v1173_v8 = vmax.f32 %v1096_v2, 0.0  ;;  %v906_v9 = vpop.f32.mrb[56].mxu0 }
 0x18c   : > { %v3229_v10 = vpack.c.bf16 %v1172_v5, %v1170_v3  ;;  %v907_v11 = vadd.f32 %v906_v9, %v3189_v49  ;;  %v908_v12 = vpop.f32.mrb[57].mxu0  ;;  %v2583_v9 = vld [vmem:[%s3482_s5 + $0x8] sm:$0xff]  }
 0x18d   : > { %v3232_v32 = vpack.c.bf16 %v1173_v8, %v1171_v6  ;;  %v909_v14 = vadd.f32 %v908_v12, %v3191_v50  ;;  %v910_v13 = vpop.f32.mrb[58].mxu0 }
 0x18e   : > { %v911_v33 = vadd.f32 %v910_v13, %v3189_v49  ;;  %v1100_v34 = vadd.f32 %v3170_v36, %v907_v11  ;;  %v912_v35 = vpop.f32.mrb[59].mxu0 }
 0x18f   : > { %v913_v15 = vadd.f32 %v912_v35, %v3191_v50  ;;  %v1102_v16 = vadd.f32 %v3172_v37, %v909_v14 }
 0x190   : > { %v1104_v17 = vadd.f32 %v3174_v38, %v911_v33  ;;  %v1174_v19 = vmax.f32 %v1100_v34, 0.0 }
 0x191   : > { %v1106_v18 = vadd.f32 %v3176_v39, %v913_v15  ;;  %v1175_v25 = vmax.f32 %v1102_v16, 0.0  ;;  %v2584_v15 = vld [vmem:[%s3482_s5 + $0x10] sm:$0xff]  }
 0x192   : > { %v1176_v23 = vmax.f32 %v1104_v17, 0.0 }
 0x193   : > { %v1177_v27 = vmax.f32 %v1106_v18, 0.0  ;;  %v916_v44 = vpop.f32.mrb[60].mxu0 }
 0x194   : > { %v3241_v20 = vpack.c.bf16 %v1176_v23, %v1174_v19  ;;  %v917_v46 = vadd.f32 %v916_v44, %v3189_v49  ;;  %v918_v47 = vpop.f32.mrb[61].mxu0  ;;  %v2585_v44 = vld [vmem:[%s3482_s5 + $0x18] sm:$0xff]  }
 0x195   : > { %v3244_v36 = vpack.c.bf16 %v1177_v27, %v1175_v25  ;;  %v919_v21 = vadd.f32 %v918_v47, %v3191_v50  ;;  %v920_v22 = vpop.f32.mrb[62].mxu0 }
 0x196   : > { %v921_v37 = vadd.f32 %v920_v22, %v3189_v49  ;;  %v1110_v38 = vadd.f32 %v3178_v40, %v917_v46  ;;  %v922_v39 = vpop.f32.mrb[63].mxu0 }
 0x197   : > { %v923_v24 = vadd.f32 %v922_v39, %v3191_v50  ;;  %v1112_v48 = vadd.f32 %v3180_v41, %v919_v21 }
 0x198   : > { %v1114_v51 = vadd.f32 %v3182_v42, %v921_v37  ;;  %v1178_v53 = vmax.f32 %v1110_v38, 0.0 }
 0x199   : > { %v1116_v52 = vadd.f32 %v3184_v43, %v923_v24  ;;  %v1179_v55 = vmax.f32 %v1112_v48, 0.0  ;;  %v2582_v43 = vld [vmem:[%s3482_s5] sm:$0xff]  }
 0x19a   : > { %v1180_v54 = vmax.f32 %v1114_v51, 0.0  ;;  %2292 = vmatprep.subr.bf16.mxu1 %v2582_v43 }
 0x19b   : > { %v1181_v56 = vmax.f32 %v1116_v52, 0.0  ;;  %v959_v57 = vpop.f32.mrb[0].mxu0 }
 0x19c   : > { %v3253_v59 = vpack.c.bf16 %v1180_v54, %v1178_v53  ;;  %v2356_v60 = vadd.f32 %v959_v57, %v3189_v49  ;;  %v961_v61 = vpop.f32.mrb[1].mxu0 }
 0x19d   : > { %v3256_v40 = vpack.c.bf16 %v1181_v56, %v1179_v55  ;;  %v2357_v62 = vadd.f32 %v961_v61, %v3191_v50  ;;  %v963_v29 = vpop.f32.mrb[2].mxu0 }
 0x19e   : > { %v2358_v41 = vadd.f32 %v963_v29, %v3189_v49  ;;  %v965_v42 = vpop.f32.mrb[3].mxu0  ;;  %v1118_v31 = vmax.f32 %v2356_v60, 0.0 }
 0x19f   : > { %v2359_v30 = vadd.f32 %v965_v42, %v3191_v50  ;;  %v1119_v0 = vmax.f32 %v2357_v62, 0.0 }
 0x1a0   : > { %v1120_v63 = vmax.f32 %v2358_v41, 0.0 }
 0x1a1   : > { %v1121_v1 = vmax.f32 %v2359_v30, 0.0 }
 0x1a2   : > { %v1182_v2 = vpack.c.bf16 %v1120_v63, %v1118_v31 }
 0x1a3   : > { %v1183_v3 = vpack.c.bf16 %v1121_v1, %v1119_v0  ;;  %v969_v5 = vpop.f32.mrb[4].mxu0 }
 0x1a4   : > { %v2360_v6 = vadd.f32 %v969_v5, %v3189_v49  ;;  %v971_v8 = vpop.f32.mrb[5].mxu0 }
 0x1a5   : > { %v2361_v11 = vadd.f32 %v971_v8, %v3191_v50  ;;  %v973_v12 = vpop.f32.mrb[6].mxu0  ;;  %1381 = vmatprep.mubr.bf16.mxu1 %v1183_v3 }
 0x1a6   : > { %v2362_v14 = vadd.f32 %v973_v12, %v3189_v49  ;;  %v975_v13 = vpop.f32.mrb[7].mxu0  ;;  %1382 = vmatmul.mubr.bf16.vlgmr.msra.gmra.mrb[24].mxu1 %v1182_v2  ;;  %v1122_v34 = vmax.f32 %v2360_v6, 0.0 }
 0x1a7   : > { %v2363_v33 = vadd.f32 %v975_v13, %v3191_v50  ;;  %2293 = vmatpush3.bf16.msra.mxu1 %v2582_v43  ;;  %v1123_v16 = vmax.f32 %v2361_v11, 0.0 }
 0x1a8   : > { %v1124_v35 = vmax.f32 %v2362_v14, 0.0  ;;  %2294 = vmatprep.subr.bf16.mxu1 %v2583_v9 }
 0x1a9   : > { %v1125_v17 = vmax.f32 %v2363_v33, 0.0 }
 0x1aa   : > { %v1184_v18 = vpack.c.bf16 %v1124_v35, %v1122_v34 }
 0x1ab   : > { %v1185_v19 = vpack.c.bf16 %v1125_v17, %v1123_v16  ;;  %v979_v23 = vpop.f32.mrb[8].mxu0  ;;  %2295 = vmatpush3.bf16.msra.mxu1 %v2583_v9 }
 0x1ac   : > { %v2364_v25 = vadd.f32 %v979_v23, %v3189_v49  ;;  %v981_v27 = vpop.f32.mrb[9].mxu0  ;;  %2296 = vmatprep.subr.bf16.mxu1 %v2584_v15 }
 0x1ad   : > { %v2365_v46 = vadd.f32 %v981_v27, %v3191_v50  ;;  %v983_v47 = vpop.f32.mrb[10].mxu0  ;;  %1389 = vmatprep.mubr.bf16.mxu1 %v1185_v19 }
 0x1ae   : > { %v2366_v21 = vadd.f32 %v983_v47, %v3189_v49  ;;  %v985_v22 = vpop.f32.mrb[11].mxu0  ;;  %1390 = vmatmul.mubr.bf16.gmra.mrb[28].mxu1 %v1184_v18  ;;  %v1126_v38 = vmax.f32 %v2364_v25, 0.0 }
 0x1af   : > { %v2367_v37 = vadd.f32 %v985_v22, %v3191_v50  ;;  %2297 = vmatpush3.bf16.msra.mxu1 %v2584_v15  ;;  %v1127_v24 = vmax.f32 %v2365_v46, 0.0 }
 0x1b0   : > { %v1128_v39 = vmax.f32 %v2366_v21, 0.0  ;;  %2298 = vmatprep.subr.bf16.mxu1 %v2585_v44 }
 0x1b1   : > { %v1129_v48 = vmax.f32 %v2367_v37, 0.0 }
 0x1b2   : > { %v1186_v51 = vpack.c.bf16 %v1128_v39, %v1126_v38 }
 0x1b3   : > { %v1187_v52 = vpack.c.bf16 %v1129_v48, %v1127_v24  ;;  %v989_v53 = vpop.f32.mrb[12].mxu0  ;;  %2299 = vmatpush3.bf16.msra.mxu1 %v2585_v44 }
 0x1b4   : > { %v2368_v54 = vadd.f32 %v989_v53, %v3189_v49  ;;  %v991_v55 = vpop.f32.mrb[13].mxu0 }
 0x1b5   : > { %v2369_v56 = vadd.f32 %v991_v55, %v3191_v50  ;;  %v993_v57 = vpop.f32.mrb[14].mxu0  ;;  %1397 = vmatprep.mubr.bf16.mxu1 %v1187_v52 }
 0x1b6   : > { %v2370_v60 = vadd.f32 %v993_v57, %v3189_v49  ;;  %v995_v61 = vpop.f32.mrb[15].mxu0  ;;  %1398 = vmatmul.mubr.bf16.gmra.mrb[32].mxu1 %v1186_v51  ;;  %v1130_v29 = vmax.f32 %v2368_v54, 0.0 }
 0x1b7   : > { %v2371_v62 = vadd.f32 %v995_v61, %v3191_v50  ;;  %v1131_v42 = vmax.f32 %v2369_v56, 0.0 }
 0x1b8   : > { %v1132_v41 = vmax.f32 %v2370_v60, 0.0 }
 0x1b9   : > { %v1133_v43 = vmax.f32 %v2371_v62, 0.0 }
 0x1ba   : > { %v1188_v30 = vpack.c.bf16 %v1132_v41, %v1130_v29 }
 0x1bb   : > { %v1189_v31 = vpack.c.bf16 %v1133_v43, %v1131_v42  ;;  %v999_v63 = vpop.f32.mrb[16].mxu0 }
 0x1bc   : > { %v2372_v0 = vadd.f32 %v999_v63, %v3189_v49  ;;  %v1001_v1 = vpop.f32.mrb[17].mxu0 }
 0x1bd   : > { %v2373_v2 = vadd.f32 %v1001_v1, %v3191_v50  ;;  %v1003_v3 = vpop.f32.mrb[18].mxu0  ;;  %1405 = vmatprep.mubr.bf16.mxu1 %v1189_v31 }
 0x1be   : > { %v2374_v5 = vadd.f32 %v1003_v3, %v3189_v49  ;;  %v1005_v6 = vpop.f32.mrb[19].mxu0  ;;  %1406 = vmatmul.mubr.bf16.gmra.mrb[36].mxu1 %v1188_v30  ;;  %v1134_v9 = vmax.f32 %v2372_v0, 0.0 }
 0x1bf   : > { %v2375_v8 = vadd.f32 %v1005_v6, %v3191_v50  ;;  %v1135_v12 = vmax.f32 %v2373_v2, 0.0 }
 0x1c0   : > { %v1136_v11 = vmax.f32 %v2374_v5, 0.0 }
 0x1c1   : > { %v1137_v14 = vmax.f32 %v2375_v8, 0.0 }
 0x1c2   : > { %v1190_v13 = vpack.c.bf16 %v1136_v11, %v1134_v9 }
 0x1c3   : > { %v1191_v33 = vpack.c.bf16 %v1137_v14, %v1135_v12  ;;  %v1009_v34 = vpop.f32.mrb[20].mxu0 }
 0x1c4   : > { %v2376_v35 = vadd.f32 %v1009_v34, %v3189_v49  ;;  %v1011_v15 = vpop.f32.mrb[21].mxu0 }
 0x1c5   : > { %v2377_v16 = vadd.f32 %v1011_v15, %v3191_v50  ;;  %v1013_v17 = vpop.f32.mrb[22].mxu0  ;;  %1413 = vmatprep.mubr.bf16.mxu1 %v1191_v33 }
 0x1c6   : > { %v2378_v18 = vadd.f32 %v1013_v17, %v3189_v49  ;;  %v1015_v19 = vpop.f32.mrb[23].mxu0  ;;  %1414 = vmatmul.mubr.bf16.gmra.mrb[40].mxu1 %v1190_v13  ;;  %v1138_v25 = vmax.f32 %v2376_v35, 0.0 }
 0x1c7   : > { %v2379_v23 = vadd.f32 %v1015_v19, %v3191_v50  ;;  %v1139_v44 = vmax.f32 %v2377_v16, 0.0 }
 0x1c8   : > { %v1140_v27 = vmax.f32 %v2378_v18, 0.0 }
 0x1c9   : > { %v1141_v46 = vmax.f32 %v2379_v23, 0.0 }
 0x1ca   : > { %v1192_v47 = vpack.c.bf16 %v1140_v27, %v1138_v25 }
 0x1cb   : > { %v1193_v21 = vpack.c.bf16 %v1141_v46, %v1139_v44  ;;  %v1019_v22 = vpop.f32.mrb[24].mxu0 }
 0x1cc   : > { %v2380_v37 = vadd.f32 %v1019_v22, %v3189_v49  ;;  %v1021_v38 = vpop.f32.mrb[25].mxu0 }
 0x1cd   : > { %v2381_v39 = vadd.f32 %v1021_v38, %v3191_v50  ;;  %v1023_v24 = vpop.f32.mrb[26].mxu0  ;;  %1421 = vmatprep.mubr.bf16.mxu1 %v1193_v21 }
 0x1ce   : > { %v2382_v48 = vadd.f32 %v1023_v24, %v3189_v49  ;;  %v1025_v51 = vpop.f32.mrb[27].mxu0  ;;  %1422 = vmatmul.mubr.bf16.gmra.mrb[44].mxu1 %v1192_v47  ;;  %v1142_v53 = vmax.f32 %v2380_v37, 0.0 }
 0x1cf   : > { %v2383_v52 = vadd.f32 %v1025_v51, %v3191_v50  ;;  %v1143_v55 = vmax.f32 %v2381_v39, 0.0 }
 0x1d0   : > { %v1144_v54 = vmax.f32 %v2382_v48, 0.0 }
 0x1d1   : > { %v1145_v56 = vmax.f32 %v2383_v52, 0.0 }
 0x1d2   : > { %v1194_v57 = vpack.c.bf16 %v1144_v54, %v1142_v53 }
 0x1d3   : > { %v1195_v60 = vpack.c.bf16 %v1145_v56, %v1143_v55  ;;  %v1029_v61 = vpop.f32.mrb[28].mxu0 }
 0x1d4   : > { %v2384_v62 = vadd.f32 %v1029_v61, %v3189_v49  ;;  %v1031_v29 = vpop.f32.mrb[29].mxu0 }
 0x1d5   : > { %v2385_v41 = vadd.f32 %v1031_v29, %v3191_v50  ;;  %v1033_v42 = vpop.f32.mrb[30].mxu0  ;;  %1429 = vmatprep.mubr.bf16.mxu1 %v1195_v60 }
 0x1d6   : > { %v2386_v43 = vadd.f32 %v1033_v42, %v3189_v49  ;;  %v1035_v30 = vpop.f32.mrb[31].mxu0  ;;  %1430 = vmatmul.mubr.bf16.gmra.mrb[48].mxu1 %v1194_v57  ;;  %v1146_v63 = vmax.f32 %v2384_v62, 0.0 }
 0x1d7   : > { %v2387_v31 = vadd.f32 %v1035_v30, %v3191_v50  ;;  %v1147_v1 = vmax.f32 %v2385_v41, 0.0 }
 0x1d8   : > { %v1148_v0 = vmax.f32 %v2386_v43, 0.0 }
 0x1d9   : > { %v1149_v2 = vmax.f32 %v2387_v31, 0.0 }
 0x1da   : > { %v1196_v3 = vpack.c.bf16 %v1148_v0, %v1146_v63 }
 0x1db   : > { %v1197_v5 = vpack.c.bf16 %v1149_v2, %v1147_v1  ;;  %v1039_v6 = vpop.f32.mrb[32].mxu0 }
 0x1dc   : > { %v2388_v8 = vadd.f32 %v1039_v6, %v3189_v49  ;;  %v1041_v9 = vpop.f32.mrb[33].mxu0 }
 0x1dd   : > { %v2389_v11 = vadd.f32 %v1041_v9, %v3191_v50  ;;  %v1043_v12 = vpop.f32.mrb[34].mxu0  ;;  %1437 = vmatprep.mubr.bf16.mxu1 %v1197_v5 }
 0x1de   : > { %v2390_v14 = vadd.f32 %v1043_v12, %v3189_v49  ;;  %v1045_v13 = vpop.f32.mrb[35].mxu0  ;;  %1438 = vmatmul.mubr.bf16.gmra.mrb[52].mxu1 %v1196_v3  ;;  %v1150_v34 = vmax.f32 %v2388_v8, 0.0 }
 0x1df   : > { %v2391_v33 = vadd.f32 %v1045_v13, %v3191_v50  ;;  %v1151_v15 = vmax.f32 %v2389_v11, 0.0 }
 0x1e0   : > { %v1152_v35 = vmax.f32 %v2390_v14, 0.0 }
 0x1e1   : > { %v1153_v16 = vmax.f32 %v2391_v33, 0.0 }
 0x1e2   : > { %v1198_v17 = vpack.c.bf16 %v1152_v35, %v1150_v34 }
 0x1e3   : > { %v1199_v18 = vpack.c.bf16 %v1153_v16, %v1151_v15  ;;  %v1049_v19 = vpop.f32.mrb[36].mxu0 }
 0x1e4   : > { %v2392_v23 = vadd.f32 %v1049_v19, %v3189_v49  ;;  %v1051_v25 = vpop.f32.mrb[37].mxu0 }
 0x1e5   : > { %v2393_v27 = vadd.f32 %v1051_v25, %v3191_v50  ;;  %v1053_v44 = vpop.f32.mrb[38].mxu0  ;;  %1445 = vmatprep.mubr.bf16.mxu1 %v1199_v18 }
 0x1e6   : > { %v2394_v46 = vadd.f32 %v1053_v44, %v3189_v49  ;;  %v1055_v47 = vpop.f32.mrb[39].mxu0  ;;  %1446 = vmatmul.mubr.bf16.gmra.mrb[56].mxu1 %v1198_v17  ;;  %v1154_v22 = vmax.f32 %v2392_v23, 0.0  ;;  %v2586_v49 = vld [vmem:[%s3482_s5 + $0x20] sm:$0xff]  }
 0x1e7   : > { %v2395_v21 = vadd.f32 %v1055_v47, %v3191_v50  ;;  %v1155_v38 = vmax.f32 %v2393_v27, 0.0  ;;  %2300 = vmatprep.subr.bf16.mxu1 %v2586_v49  ;;  %v2587_v50 = vld [vmem:[%s3482_s5 + $0x28] sm:$0xff]  }
 0x1e8   : > { %v1156_v37 = vmax.f32 %v2394_v46, 0.0  ;;  %2301 = vmatpush3.bf16.msra.mxu1 %v2586_v49 }
 0x1e9   : > { %v1157_v39 = vmax.f32 %v2395_v21, 0.0  ;;  %2302 = vmatprep.subr.bf16.mxu1 %v2587_v50 }
 0x1ea   : > { %v1200_v24 = vpack.c.bf16 %v1156_v37, %v1154_v22 }
 0x1eb   : > { %v1201_v48 = vpack.c.bf16 %v1157_v39, %v1155_v38 }
 0x1ec   : > { %2303 = vmatpush3.bf16.msra.mxu1 %v2587_v50 }
 0x1ed   : > { %1453 = vmatprep.mubr.bf16.mxu1 %v1201_v48 }
 0x1ee   : > { %1454 = vmatmul.mubr.bf16.gmra.mrb[60].mxu1 %v1200_v24 }
 0x1ef   : > { %1461 = vmatprep.mubr.bf16.mxu1 %v3200_v7  ;;  %v2589_v7 = vld [vmem:[%s3482_s5 + $0x38] sm:$0xff]  }
 0x1f6   : > { %1462 = vmatmul.mubr.bf16.gmra.mrb[64].mxu1 %v3197_v4  ;;  %v2588_v4 = vld [vmem:[%s3482_s5 + $0x30] sm:$0xff]  }
 0x1f7   : > { %1469 = vmatprep.mubr.bf16.mxu1 %v3208_v45  ;;  %2304 = vmatprep.subr.bf16.mxu1 %v2588_v4  ;;  %v3336_v45 = vld [vmem:[%s3481_s4] ss:$0 sm:$0xff] }
 0x1f8   : > { %2305 = vmatpush3.bf16.msra.mxu1 %v2588_v4 }
 0x1f9   : > { %2306 = vmatprep.subr.bf16.mxu1 %v2589_v7 }
 0x1fc   : > { %2307 = vmatpush3.bf16.msra.mxu1 %v2589_v7 }
 0x1fe   : > { %1470 = vmatmul.mubr.bf16.gmra.mrb[68].mxu1 %v3205_v26 }
 0x1ff   : > { %1477 = vmatprep.mubr.bf16.mxu1 %v3220_v28 }
 0x206   : > { %1478 = vmatmul.mubr.bf16.gmra.mrb[72].mxu1 %v3217_v58 }
 0x207   : > { %1485 = vmatprep.mubr.bf16.mxu1 %v3232_v32 }
 0x20e   : > { %1486 = vmatmul.mubr.bf16.gmra.mrb[76].mxu1 %v3229_v10 }
 0x20f   : > { %1493 = vmatprep.mubr.bf16.mxu1 %v3244_v36 }
 0x216   : > { %1494 = vmatmul.mubr.bf16.gmra.mrb[80].mxu1 %v3241_v20 }
 0x217   : > { %1501 = vmatprep.mubr.bf16.mxu1 %v3256_v40 }
 0x21e   : > { %1502 = vmatmul.mubr.bf16.gmra.mrb[84].mxu1 %v3253_v59 }
 0x279   : > { %v2172_v26 = vpop.f32.mrb[24].mxu1 }
 0x27a   : > { %v2173_v58 = vpop.f32.mrb[25].mxu1 }
 0x27b   : > { %v2174_v28 = vadd.f32 %v2173_v58, %v2172_v26  ;;  %v2175_v32 = vpop.f32.mrb[26].mxu1 }
 0x27c   : > { %v2176_v51 = vpop.f32.mrb[27].mxu1 }
 0x27d   : > { %v1384_v10 = vadd.f32 %v2174_v28, %v3336_v45  ;;  %v2177_v52 = vadd.f32 %v2176_v51, %v2175_v32 }
 0x27f   : > { %v1387_v36 = vadd.f32 %v2177_v52, %v3336_v45  ;;  %v1510_v20 = vmax.f32 %v1384_v10, 0.0 }
 0x281   : > { %v1511_v53 = vmax.f32 %v1387_v36, 0.0  ;;  %v2178_v40 = vpop.f32.mrb[28].mxu1 }
 0x282   : > { %v2179_v54 = vpop.f32.mrb[29].mxu1 }
 0x283   : > { %v2180_v59 = vadd.f32 %v2179_v54, %v2178_v40  ;;  %v2181_v55 = vpop.f32.mrb[30].mxu1  ;;  %v1542_v56 = vpack.c.bf16 %v1511_v53, %v1510_v20 }
 0x284   : > { %v2182_v57 = vpop.f32.mrb[31].mxu1 }
 0x285   : > { %v1392_v60 = vadd.f32 %v2180_v59, %v3336_v45  ;;  %v2183_v61 = vadd.f32 %v2182_v57, %v2181_v55  ;;  %2308 = vmatprep.mubr.bf16.mxu1 %v1542_v56 }
 0x287   : > { %v1395_v62 = vadd.f32 %v2183_v61, %v3336_v45  ;;  %v1512_v29 = vmax.f32 %v1392_v60, 0.0 }
 0x289   : > { %v1513_v41 = vmax.f32 %v1395_v62, 0.0  ;;  %v2184_v42 = vpop.f32.mrb[32].mxu1 }
 0x28a   : > { %v2185_v43 = vpop.f32.mrb[33].mxu1 }
 0x28b   : > { %v1543_v30 = vpack.c.bf16 %v1513_v41, %v1512_v29  ;;  %v2186_v31 = vadd.f32 %v2185_v43, %v2184_v42  ;;  %v2187_v63 = vpop.f32.mrb[34].mxu1 }
 0x28c   : > { %v2188_v0 = vpop.f32.mrb[35].mxu1 }
 0x28d   : > { %v1400_v1 = vadd.f32 %v2186_v31, %v3336_v45  ;;  %v2189_v2 = vadd.f32 %v2188_v0, %v2187_v63  ;;  %2309 = vmatmul.mubr.bf16.vlgmr.msra.gmra.mrb[88].mxu1 %v1543_v30 }
 0x28f   : > { %v1403_v3 = vadd.f32 %v2189_v2, %v3336_v45  ;;  %v1514_v5 = vmax.f32 %v1400_v1, 0.0 }
 0x291   : > { %v1515_v6 = vmax.f32 %v1403_v3, 0.0  ;;  %v2190_v8 = vpop.f32.mrb[36].mxu1 }
 0x292   : > { %v2191_v9 = vpop.f32.mrb[37].mxu1 }
 0x293   : > { %v2192_v11 = vadd.f32 %v2191_v9, %v2190_v8  ;;  %v2193_v12 = vpop.f32.mrb[38].mxu1  ;;  %v1544_v14 = vpack.c.bf16 %v1515_v6, %v1514_v5 }
 0x294   : > { %v2194_v13 = vpop.f32.mrb[39].mxu1 }
 0x295   : > { %v1408_v33 = vadd.f32 %v2192_v11, %v3336_v45  ;;  %v2195_v34 = vadd.f32 %v2194_v13, %v2193_v12  ;;  %2312 = vmatprep.mubr.bf16.mxu1 %v1544_v14 }
 0x297   : > { %v1411_v35 = vadd.f32 %v2195_v34, %v3336_v45  ;;  %v1516_v15 = vmax.f32 %v1408_v33, 0.0 }
 0x299   : > { %v1517_v16 = vmax.f32 %v1411_v35, 0.0  ;;  %v2196_v17 = vpop.f32.mrb[40].mxu1 }
 0x29a   : > { %v2197_v18 = vpop.f32.mrb[41].mxu1 }
 0x29b   : > { %v2198_v19 = vadd.f32 %v2197_v18, %v2196_v17  ;;  %v2199_v23 = vpop.f32.mrb[42].mxu1  ;;  %v1545_v25 = vpack.c.bf16 %v1517_v16, %v1516_v15 }
 0x29c   : > { %v2200_v27 = vpop.f32.mrb[43].mxu1 }
 0x29d   : > { %v1416_v44 = vadd.f32 %v2198_v19, %v3336_v45  ;;  %v2201_v46 = vadd.f32 %v2200_v27, %v2199_v23  ;;  %2313 = vmatmul.mubr.bf16.gmra.mrb[92].mxu1 %v1545_v25 }
 0x29f   : > { %v1419_v47 = vadd.f32 %v2201_v46, %v3336_v45  ;;  %v1518_v21 = vmax.f32 %v1416_v44, 0.0 }
 0x2a1   : > { %v1519_v22 = vmax.f32 %v1419_v47, 0.0  ;;  %v2202_v37 = vpop.f32.mrb[44].mxu1 }
 0x2a2   : > { %v2203_v38 = vpop.f32.mrb[45].mxu1 }
 0x2a3   : > { %v2204_v39 = vadd.f32 %v2203_v38, %v2202_v37  ;;  %v2205_v24 = vpop.f32.mrb[46].mxu1  ;;  %v1546_v48 = vpack.c.bf16 %v1519_v22, %v1518_v21 }
 0x2a4   : > { %v2206_v49 = vpop.f32.mrb[47].mxu1 }
 0x2a5   : > { %v1424_v50 = vadd.f32 %v2204_v39, %v3336_v45  ;;  %v2207_v4 = vadd.f32 %v2206_v49, %v2205_v24  ;;  %2316 = vmatprep.mubr.bf16.mxu1 %v1546_v48 }
 0x2a7   : > { %v1427_v7 = vadd.f32 %v2207_v4, %v3336_v45  ;;  %v1520_v26 = vmax.f32 %v1424_v50, 0.0 }
 0x2a9   : > { %v1521_v58 = vmax.f32 %v1427_v7, 0.0  ;;  %v2208_v28 = vpop.f32.mrb[48].mxu1 }
 0x2aa   : > { %v2209_v32 = vpop.f32.mrb[49].mxu1 }
 0x2ab   : > { %v2210_v51 = vadd.f32 %v2209_v32, %v2208_v28  ;;  %v2211_v10 = vpop.f32.mrb[50].mxu1  ;;  %v1547_v52 = vpack.c.bf16 %v1521_v58, %v1520_v26 }
 0x2ac   : > { %v2212_v36 = vpop.f32.mrb[51].mxu1 }
 0x2ad   : > { %v1432_v20 = vadd.f32 %v2210_v51, %v3336_v45  ;;  %v2213_v53 = vadd.f32 %v2212_v36, %v2211_v10  ;;  %2317 = vmatmul.mubr.bf16.gmra.mrb[96].mxu1 %v1547_v52 }
 0x2af   : > { %v1435_v40 = vadd.f32 %v2213_v53, %v3336_v45  ;;  %v1522_v54 = vmax.f32 %v1432_v20, 0.0 }
 0x2b1   : > { %v1523_v59 = vmax.f32 %v1435_v40, 0.0  ;;  %v2214_v55 = vpop.f32.mrb[52].mxu1 }
 0x2b2   : > { %v2215_v56 = vpop.f32.mrb[53].mxu1 }
 0x2b3   : > { %v2216_v57 = vadd.f32 %v2215_v56, %v2214_v55  ;;  %v2217_v60 = vpop.f32.mrb[54].mxu1  ;;  %v1548_v61 = vpack.c.bf16 %v1523_v59, %v1522_v54 }
 0x2b4   : > { %v2218_v62 = vpop.f32.mrb[55].mxu1 }
 0x2b5   : > { %v1440_v29 = vadd.f32 %v2216_v57, %v3336_v45  ;;  %v2219_v41 = vadd.f32 %v2218_v62, %v2217_v60  ;;  %2320 = vmatprep.mubr.bf16.mxu1 %v1548_v61 }
 0x2b7   : > { %v1443_v42 = vadd.f32 %v2219_v41, %v3336_v45  ;;  %v1524_v43 = vmax.f32 %v1440_v29, 0.0 }
 0x2b9   : > { %v1525_v30 = vmax.f32 %v1443_v42, 0.0  ;;  %v2220_v31 = vpop.f32.mrb[56].mxu1 }
 0x2ba   : > { %v2221_v63 = vpop.f32.mrb[57].mxu1 }
 0x2bb   : > { %v2222_v0 = vadd.f32 %v2221_v63, %v2220_v31  ;;  %v2223_v1 = vpop.f32.mrb[58].mxu1  ;;  %v1549_v2 = vpack.c.bf16 %v1525_v30, %v1524_v43 }
 0x2bc   : > { %v2224_v3 = vpop.f32.mrb[59].mxu1 }
 0x2bd   : > { %v1448_v5 = vadd.f32 %v2222_v0, %v3336_v45  ;;  %v2225_v6 = vadd.f32 %v2224_v3, %v2223_v1  ;;  %2321 = vmatmul.mubr.bf16.gmra.mrb[100].mxu1 %v1549_v2 }
 0x2bf   : > { %v1451_v8 = vadd.f32 %v2225_v6, %v3336_v45  ;;  %v1526_v9 = vmax.f32 %v1448_v5, 0.0 }
 0x2c1   : > { %v1527_v11 = vmax.f32 %v1451_v8, 0.0  ;;  %v2226_v12 = vpop.f32.mrb[60].mxu1 }
 0x2c2   : > { %v2227_v14 = vpop.f32.mrb[61].mxu1 }
 0x2c3   : > { %v2228_v13 = vadd.f32 %v2227_v14, %v2226_v12  ;;  %v2229_v33 = vpop.f32.mrb[62].mxu1  ;;  %v1550_v34 = vpack.c.bf16 %v1527_v11, %v1526_v9 }
 0x2c4   : > { %v2230_v35 = vpop.f32.mrb[63].mxu1 }
 0x2c5   : > { %v1456_v15 = vadd.f32 %v2228_v13, %v3336_v45  ;;  %v2231_v16 = vadd.f32 %v2230_v35, %v2229_v33  ;;  %2324 = vmatprep.mubr.bf16.mxu1 %v1550_v34 }
 0x2c7   : > { %v1459_v17 = vadd.f32 %v2231_v16, %v3336_v45  ;;  %v1528_v18 = vmax.f32 %v1456_v15, 0.0 }
 0x2c9   : > { %v1529_v19 = vmax.f32 %v1459_v17, 0.0  ;;  %v2232_v23 = vpop.f32.mrb[64].mxu1 }
 0x2ca   : > { %v2233_v25 = vpop.f32.mrb[65].mxu1 }
 0x2cb   : > { %v2234_v27 = vadd.f32 %v2233_v25, %v2232_v23  ;;  %v2235_v44 = vpop.f32.mrb[66].mxu1  ;;  %v1551_v46 = vpack.c.bf16 %v1529_v19, %v1528_v18 }
 0x2cc   : > { %v2236_v47 = vpop.f32.mrb[67].mxu1 }
 0x2cd   : > { %v1464_v21 = vadd.f32 %v2234_v27, %v3336_v45  ;;  %v2237_v22 = vadd.f32 %v2236_v47, %v2235_v44  ;;  %2325 = vmatmul.mubr.bf16.gmra.mrb[104].mxu1 %v1551_v46  ;;  %v3370_v46 = vld [vmem:[#allocation2] ss:$0 sm:$0xff] }
 0x2cf   : > { %v1467_v37 = vadd.f32 %v2237_v22, %v3336_v45  ;;  %v1530_v38 = vmax.f32 %v1464_v21, 0.0 }
 0x2d1   : > { %v1531_v39 = vmax.f32 %v1467_v37, 0.0  ;;  %v2238_v24 = vpop.f32.mrb[68].mxu1 }
 0x2d2   : > { %v2239_v48 = vpop.f32.mrb[69].mxu1 }
 0x2d3   : > { %v2240_v49 = vadd.f32 %v2239_v48, %v2238_v24  ;;  %v2241_v50 = vpop.f32.mrb[70].mxu1  ;;  %v1552_v4 = vpack.c.bf16 %v1531_v39, %v1530_v38 }
 0x2d4   : > { %v2242_v7 = vpop.f32.mrb[71].mxu1 }
 0x2d5   : > { %v1472_v26 = vadd.f32 %v2240_v49, %v3336_v45  ;;  %v2243_v58 = vadd.f32 %v2242_v7, %v2241_v50  ;;  %2328 = vmatprep.mubr.bf16.mxu1 %v1552_v4 }
 0x2d7   : > { %v1475_v28 = vadd.f32 %v2243_v58, %v3336_v45  ;;  %v1532_v32 = vmax.f32 %v1472_v26, 0.0 }
 0x2d9   : > { %v1533_v51 = vmax.f32 %v1475_v28, 0.0  ;;  %v2244_v10 = vpop.f32.mrb[72].mxu1 }
 0x2da   : > { %v2245_v52 = vpop.f32.mrb[73].mxu1 }
 0x2db   : > { %v2246_v36 = vadd.f32 %v2245_v52, %v2244_v10  ;;  %v2247_v20 = vpop.f32.mrb[74].mxu1  ;;  %v1553_v53 = vpack.c.bf16 %v1533_v51, %v1532_v32 }
 0x2dc   : > { %v2248_v40 = vpop.f32.mrb[75].mxu1 }
 0x2dd   : > { %v1480_v54 = vadd.f32 %v2246_v36, %v3336_v45  ;;  %v2249_v59 = vadd.f32 %v2248_v40, %v2247_v20  ;;  %2329 = vmatmul.mubr.bf16.gmra.mrb[108].mxu1 %v1553_v53 }
 0x2df   : > { %v1483_v55 = vadd.f32 %v2249_v59, %v3336_v45  ;;  %v1534_v56 = vmax.f32 %v1480_v54, 0.0 }
 0x2e1   : > { %v1535_v57 = vmax.f32 %v1483_v55, 0.0  ;;  %v2250_v60 = vpop.f32.mrb[76].mxu1 }
 0x2e2   : > { %v2251_v61 = vpop.f32.mrb[77].mxu1 }
 0x2e3   : > { %v2252_v62 = vadd.f32 %v2251_v61, %v2250_v60  ;;  %v2253_v29 = vpop.f32.mrb[78].mxu1  ;;  %v1554_v41 = vpack.c.bf16 %v1535_v57, %v1534_v56 }
 0x2e4   : > { %v2254_v42 = vpop.f32.mrb[79].mxu1 }
 0x2e5   : > { %v1488_v43 = vadd.f32 %v2252_v62, %v3336_v45  ;;  %v2255_v30 = vadd.f32 %v2254_v42, %v2253_v29  ;;  %2332 = vmatprep.mubr.bf16.mxu1 %v1554_v41 }
 0x2e7   : > { %v1491_v31 = vadd.f32 %v2255_v30, %v3336_v45  ;;  %v1536_v63 = vmax.f32 %v1488_v43, 0.0 }
 0x2e9   : > { %v1537_v0 = vmax.f32 %v1491_v31, 0.0  ;;  %v2256_v1 = vpop.f32.mrb[80].mxu1 }
 0x2ea   : > { %v2257_v2 = vpop.f32.mrb[81].mxu1 }
 0x2eb   : > { %v2258_v3 = vadd.f32 %v2257_v2, %v2256_v1  ;;  %v2259_v5 = vpop.f32.mrb[82].mxu1  ;;  %v1555_v6 = vpack.c.bf16 %v1537_v0, %v1536_v63 }
 0x2ec   : > { %v2260_v8 = vpop.f32.mrb[83].mxu1 }
 0x2ed   : > { %v1496_v9 = vadd.f32 %v2258_v3, %v3336_v45  ;;  %v2261_v11 = vadd.f32 %v2260_v8, %v2259_v5  ;;  %2333 = vmatmul.mubr.bf16.gmra.mrb[112].mxu1 %v1555_v6 }
 0x2ef   : > { %v1499_v12 = vadd.f32 %v2261_v11, %v3336_v45  ;;  %v1538_v14 = vmax.f32 %v1496_v9, 0.0 }
 0x2f1   : > { %v1539_v13 = vmax.f32 %v1499_v12, 0.0  ;;  %v2262_v33 = vpop.f32.mrb[84].mxu1 }
 0x2f2   : > { %v2263_v34 = vpop.f32.mrb[85].mxu1 }
 0x2f3   : > { %v2264_v35 = vadd.f32 %v2263_v34, %v2262_v33  ;;  %v2265_v15 = vpop.f32.mrb[86].mxu1  ;;  %v1556_v16 = vpack.c.bf16 %v1539_v13, %v1538_v14 }
 0x2f4   : > { %v2266_v17 = vpop.f32.mrb[87].mxu1 }
 0x2f5   : > { %v1504_v18 = vadd.f32 %v2264_v35, %v3336_v45  ;;  %v2267_v19 = vadd.f32 %v2266_v17, %v2265_v15  ;;  %2336 = vmatprep.mubr.bf16.mxu1 %v1556_v16 }
 0x2f7   : > { %v1507_v23 = vadd.f32 %v2267_v19, %v3336_v45  ;;  %v1540_v25 = vmax.f32 %v1504_v18, 0.0 }
 0x2f9   : > { %v1541_v27 = vmax.f32 %v1507_v23, 0.0 }
 0x2fb   : > { %v1557_v44 = vpack.c.bf16 %v1541_v27, %v1540_v25 }
 0x2fd   : > { %2337 = vmatmul.mubr.bf16.gmra.mrb[116].mxu1 %v1557_v44 }
 0x360   : > { %v2310_v47 = vpop.f32.mrb[88].mxu1 }
 0x361   : > { %v1792_v21 = vadd.f32 %v2310_v47, %v3370_v46  ;;  %v1656_v22 = vpop.f32.mrb[89].mxu1 }
 0x362   : > { %v1790_v37 = vadd.f32 %v3370_v46, %v1656_v22  ;;  %v2311_v38 = vpop.f32.mrb[90].mxu1 }
 0x363   : > { %v1824_v39 = vsub.f32 0.0, %v1792_v21  ;;  %v1793_v24 = vadd.f32 %v2311_v38, %v3370_v46  ;;  %v1659_v48 = vpop.f32.mrb[91].mxu1 }
 0x364   : > { %v1822_v49 = vsub.f32 0.0, %v1790_v37  ;;  %v1791_v45 = vadd.f32 %v3370_v46, %v1659_v48 }
 0x365   : > { %v1858_v50 = vmul.f32 1.442695, %v1824_v39  ;;  %v1825_v4 = vsub.f32 0.0, %v1793_v24 }
 0x366   : > { %v1854_v7 = vmul.f32 1.442695, %v1822_v49  ;;  %v1823_v26 = vsub.f32 0.0, %v1791_v45 }
 0x367   : > { %2590 = vpow2.f32 %v1858_v50  ;;  %v1860_v58 = vmul.f32 1.442695, %v1825_v4 }
 0x368   : > { %2592 = vpow2.f32 %v1854_v7  ;;  %v1856_v28 = vmul.f32 1.442695, %v1823_v26 }
 0x369   : > { %2594 = vpow2.f32 %v1860_v58 }
 0x36a   : > { %2596 = vpow2.f32 %v1856_v28 }
 0x370   : > { %v2314_v32 = vpop.f32.mrb[92].mxu1 }
 0x371   : > { %v2591_v51 = vpop.eup %2590  ;;  %v1796_v10 = vadd.f32 %v2314_v32, %v3370_v46  ;;  %v1672_v52 = vpop.f32.mrb[93].mxu1 }
 0x372   : > { %v2593_v36 = vpop.eup %2592  ;;  %v1920_v20 = vadd.f32 1.0, %v2591_v51  ;;  %v1794_v53 = vadd.f32 %v3370_v46, %v1672_v52  ;;  %v2315_v40 = vpop.f32.mrb[94].mxu1 }
 0x373   : > { %v2595_v54 = vpop.eup %2594  ;;  %v1918_v59 = vadd.f32 1.0, %v2593_v36  ;;  %v1828_v55 = vsub.f32 0.0, %v1796_v10  ;;  %v1797_v56 = vadd.f32 %v2315_v40, %v3370_v46  ;;  %v1675_v57 = vpop.f32.mrb[95].mxu1 }
 0x374   : > { %v2597_v60 = vpop.eup %2596  ;;  %2598 = vrcp.f32 %v1920_v20  ;;  %v1921_v61 = vadd.f32 1.0, %v2595_v54  ;;  %v1826_v62 = vsub.f32 0.0, %v1794_v53  ;;  %v1795_v29 = vadd.f32 %v3370_v46, %v1675_v57 }
 0x375   : > { %2600 = vrcp.f32 %v1918_v59  ;;  %v1919_v41 = vadd.f32 1.0, %v2597_v60  ;;  %v1866_v42 = vmul.f32 1.442695, %v1828_v55  ;;  %v1829_v43 = vsub.f32 0.0, %v1797_v56 }
 0x376   : > { %2602 = vrcp.f32 %v1921_v61  ;;  %v1862_v30 = vmul.f32 1.442695, %v1826_v62  ;;  %v1827_v31 = vsub.f32 0.0, %v1795_v29 }
 0x377   : > { %2604 = vrcp.f32 %v1919_v41  ;;  %v1868_v63 = vmul.f32 1.442695, %v1829_v43 }
 0x378   : > { %2606 = vpow2.f32 %v1866_v42  ;;  %v1864_v0 = vmul.f32 1.442695, %v1827_v31 }
 0x379   : > { %2608 = vpow2.f32 %v1862_v30 }
 0x37a   : > { %2610 = vpow2.f32 %v1868_v63 }
 0x37b   : > { %2612 = vpow2.f32 %v1864_v0 }
 0x37e   : > { %v2599_v1 = vpop.eup %2598 }
 0x37f   : > { %v2601_v2 = vpop.eup %2600  ;;  %1985 = vst.msk [vmem:[%s3384_s9 + $0x10] sm:$0xff] %vm1982_vm0, %v2599_v1 }
 0x380   : > { %v2603_v3 = vpop.eup %2602  ;;  %1983 = vst.msk [vmem:[%s3384_s9] sm:$0xff] %vm1982_vm0, %v2601_v2  ;;  %v2318_v5 = vpop.f32.mrb[96].mxu1 }
 0x381   : > { %v2605_v6 = vpop.eup %2604  ;;  %1986 = vst.msk [vmem:[%s3384_s9 + $0x18] sm:$0xff] %vm1982_vm0, %v2603_v3  ;;  %v1800_v8 = vadd.f32 %v2318_v5, %v3370_v46  ;;  %v1688_v9 = vpop.f32.mrb[97].mxu1 }
 0x382   : > { %v2607_v11 = vpop.eup %2606  ;;  %1984 = vst.msk [vmem:[%s3384_s9 + $0x8] sm:$0xff] %vm1982_vm0, %v2605_v6  ;;  %v1798_v12 = vadd.f32 %v3370_v46, %v1688_v9  ;;  %v2319_v14 = vpop.f32.mrb[98].mxu1 }
 0x383   : > { %v2609_v13 = vpop.eup %2608  ;;  %v1924_v33 = vadd.f32 1.0, %v2607_v11  ;;  %v1832_v34 = vsub.f32 0.0, %v1800_v8  ;;  %v1801_v35 = vadd.f32 %v2319_v14, %v3370_v46  ;;  %v1691_v15 = vpop.f32.mrb[99].mxu1 }
 0x384   : > { %v2611_v16 = vpop.eup %2610  ;;  %v1922_v17 = vadd.f32 1.0, %v2609_v13  ;;  %v1830_v18 = vsub.f32 0.0, %v1798_v12  ;;  %v1799_v19 = vadd.f32 %v3370_v46, %v1691_v15 }
 0x385   : > { %v2613_v23 = vpop.eup %2612  ;;  %2614 = vrcp.f32 %v1924_v33  ;;  %v1925_v25 = vadd.f32 1.0, %v2611_v16  ;;  %v1874_v27 = vmul.f32 1.442695, %v1832_v34  ;;  %v1833_v44 = vsub.f32 0.0, %v1801_v35 }
 0x386   : > { %2616 = vrcp.f32 %v1922_v17  ;;  %v1923_v47 = vadd.f32 1.0, %v2613_v23  ;;  %v1870_v21 = vmul.f32 1.442695, %v1830_v18  ;;  %v1831_v22 = vsub.f32 0.0, %v1799_v19 }
 0x387   : > { %2618 = vrcp.f32 %v1925_v25  ;;  %v1876_v37 = vmul.f32 1.442695, %v1833_v44 }
 0x388   : > { %2620 = vrcp.f32 %v1923_v47  ;;  %v1872_v38 = vmul.f32 1.442695, %v1831_v22 }
 0x389   : > { %2622 = vpow2.f32 %v1874_v27 }
 0x38a   : > { %2624 = vpow2.f32 %v1870_v21 }
 0x38b   : > { %2626 = vpow2.f32 %v1876_v37 }
 0x38c   : > { %2628 = vpow2.f32 %v1872_v38 }
 0x38f   : > { %v2615_v39 = vpop.eup %2614 }
 0x390   : > { %v2617_v24 = vpop.eup %2616  ;;  %1989 = vst.msk [vmem:[%s3384_s9 + $0x30] sm:$0xff] %vm1982_vm0, %v2615_v39  ;;  %v2322_v48 = vpop.f32.mrb[100].mxu1 }
 0x391   : > { %v2619_v49 = vpop.eup %2618  ;;  %1987 = vst.msk [vmem:[%s3384_s9 + $0x20] sm:$0xff] %vm1982_vm0, %v2617_v24  ;;  %v1804_v45 = vadd.f32 %v2322_v48, %v3370_v46  ;;  %v1704_v50 = vpop.f32.mrb[101].mxu1 }
 0x392   : > { %v2621_v4 = vpop.eup %2620  ;;  %1990 = vst.msk [vmem:[%s3384_s9 + $0x38] sm:$0xff] %vm1982_vm0, %v2619_v49  ;;  %v1802_v7 = vadd.f32 %v3370_v46, %v1704_v50  ;;  %v2323_v26 = vpop.f32.mrb[102].mxu1 }
 0x393   : > { %v2623_v58 = vpop.eup %2622  ;;  %1988 = vst.msk [vmem:[%s3384_s9 + $0x28] sm:$0xff] %vm1982_vm0, %v2621_v4  ;;  %v1836_v28 = vsub.f32 0.0, %v1804_v45  ;;  %v1805_v32 = vadd.f32 %v2323_v26, %v3370_v46  ;;  %v1707_v51 = vpop.f32.mrb[103].mxu1 }
 0x394   : > { %v2625_v10 = vpop.eup %2624  ;;  %v1928_v52 = vadd.f32 1.0, %v2623_v58  ;;  %v1834_v36 = vsub.f32 0.0, %v1802_v7  ;;  %v1803_v20 = vadd.f32 %v3370_v46, %v1707_v51 }
 0x395   : > { %v2627_v53 = vpop.eup %2626  ;;  %v1926_v40 = vadd.f32 1.0, %v2625_v10  ;;  %v1837_v54 = vsub.f32 0.0, %v1805_v32  ;;  %v1882_v56 = vmul.f32 1.442695, %v1836_v28 }
 0x396   : > { %v2629_v59 = vpop.eup %2628  ;;  %2630 = vrcp.f32 %v1928_v52  ;;  %v1929_v55 = vadd.f32 1.0, %v2627_v53  ;;  %v1835_v57 = vsub.f32 0.0, %v1803_v20  ;;  %v1878_v61 = vmul.f32 1.442695, %v1834_v36 }
 0x397   : > { %2632 = vrcp.f32 %v1926_v40  ;;  %v1927_v60 = vadd.f32 1.0, %v2629_v59  ;;  %v1884_v62 = vmul.f32 1.442695, %v1837_v54 }
 0x398   : > { %2634 = vrcp.f32 %v1929_v55  ;;  %v1880_v29 = vmul.f32 1.442695, %v1835_v57 }
 0x399   : > { %2636 = vrcp.f32 %v1927_v60 }
 0x39a   : > { %2638 = vpow2.f32 %v1882_v56 }
 0x39b   : > { %2640 = vpow2.f32 %v1878_v61 }
 0x39c   : > { %2642 = vpow2.f32 %v1884_v62 }
 0x39d   : > { %2644 = vpow2.f32 %v1880_v29 }
 0x3a0   : > { %v2631_v41 = vpop.eup %2630  ;;  %v2326_v42 = vpop.f32.mrb[104].mxu1 }
 0x3a1   : > { %v2633_v43 = vpop.eup %2632  ;;  %1993 = vst.msk [vmem:[%s3384_s9 + $0x50] sm:$0xff] %vm1982_vm0, %v2631_v41  ;;  %v1808_v30 = vadd.f32 %v2326_v42, %v3370_v46  ;;  %v1720_v31 = vpop.f32.mrb[105].mxu1 }
 0x3a2   : > { %v2635_v63 = vpop.eup %2634  ;;  %1991 = vst.msk [vmem:[%s3384_s9 + $0x40] sm:$0xff] %vm1982_vm0, %v2633_v43  ;;  %v1806_v0 = vadd.f32 %v3370_v46, %v1720_v31  ;;  %v2327_v1 = vpop.f32.mrb[106].mxu1 }
 0x3a3   : > { %v2637_v2 = vpop.eup %2636  ;;  %1994 = vst.msk [vmem:[%s3384_s9 + $0x58] sm:$0xff] %vm1982_vm0, %v2635_v63  ;;  %v1840_v3 = vsub.f32 0.0, %v1808_v30  ;;  %v1809_v5 = vadd.f32 %v2327_v1, %v3370_v46  ;;  %v1723_v6 = vpop.f32.mrb[107].mxu1 }
 0x3a4   : > { %v2639_v8 = vpop.eup %2638  ;;  %1992 = vst.msk [vmem:[%s3384_s9 + $0x48] sm:$0xff] %vm1982_vm0, %v2637_v2  ;;  %v1838_v9 = vsub.f32 0.0, %v1806_v0  ;;  %v1807_v11 = vadd.f32 %v3370_v46, %v1723_v6 }
 0x3a5   : > { %v2641_v12 = vpop.eup %2640  ;;  %v1932_v14 = vadd.f32 1.0, %v2639_v8  ;;  %v1841_v13 = vsub.f32 0.0, %v1809_v5  ;;  %v1890_v17 = vmul.f32 1.442695, %v1840_v3 }
 0x3a6   : > { %v2643_v33 = vpop.eup %2642  ;;  %v1930_v34 = vadd.f32 1.0, %v2641_v12  ;;  %v1839_v35 = vsub.f32 0.0, %v1807_v11  ;;  %v1886_v19 = vmul.f32 1.442695, %v1838_v9 }
 0x3a7   : > { %v2645_v15 = vpop.eup %2644  ;;  %2646 = vrcp.f32 %v1932_v14  ;;  %v1933_v16 = vadd.f32 1.0, %v2643_v33  ;;  %v1892_v23 = vmul.f32 1.442695, %v1841_v13 }
 0x3a8   : > { %2648 = vrcp.f32 %v1930_v34  ;;  %v1931_v18 = vadd.f32 1.0, %v2645_v15  ;;  %v1888_v25 = vmul.f32 1.442695, %v1839_v35 }
 0x3a9   : > { %2650 = vrcp.f32 %v1933_v16 }
 0x3aa   : > { %2652 = vrcp.f32 %v1931_v18 }
 0x3ab   : > { %2654 = vpow2.f32 %v1890_v17 }
 0x3ac   : > { %2656 = vpow2.f32 %v1886_v19 }
 0x3ad   : > { %2658 = vpow2.f32 %v1892_v23 }
 0x3ae   : > { %2660 = vpow2.f32 %v1888_v25 }
 0x3b0   : > { %v2330_v27 = vpop.f32.mrb[108].mxu1 }
 0x3b1   : > { %v2647_v44 = vpop.eup %2646  ;;  %v1812_v47 = vadd.f32 %v2330_v27, %v3370_v46  ;;  %v1736_v21 = vpop.f32.mrb[109].mxu1 }
 0x3b2   : > { %v2649_v22 = vpop.eup %2648  ;;  %1997 = vst.msk [vmem:[%s3384_s9 + $0x70] sm:$0xff] %vm1982_vm0, %v2647_v44  ;;  %v1810_v37 = vadd.f32 %v3370_v46, %v1736_v21  ;;  %v2331_v38 = vpop.f32.mrb[110].mxu1 }
 0x3b3   : > { %v2651_v39 = vpop.eup %2650  ;;  %1995 = vst.msk [vmem:[%s3384_s9 + $0x60] sm:$0xff] %vm1982_vm0, %v2649_v22  ;;  %v1844_v24 = vsub.f32 0.0, %v1812_v47  ;;  %v1813_v48 = vadd.f32 %v2331_v38, %v3370_v46  ;;  %v1739_v49 = vpop.f32.mrb[111].mxu1 }
 0x3b4   : > { %v2653_v45 = vpop.eup %2652  ;;  %1998 = vst.msk [vmem:[%s3384_s9 + $0x78] sm:$0xff] %vm1982_vm0, %v2651_v39  ;;  %v1842_v50 = vsub.f32 0.0, %v1810_v37  ;;  %v1811_v4 = vadd.f32 %v3370_v46, %v1739_v49 }
 0x3b5   : > { %v2655_v7 = vpop.eup %2654  ;;  %1996 = vst.msk [vmem:[%s3384_s9 + $0x68] sm:$0xff] %vm1982_vm0, %v2653_v45  ;;  %v1898_v26 = vmul.f32 1.442695, %v1844_v24  ;;  %v1845_v58 = vsub.f32 0.0, %v1813_v48 }
 0x3b6   : > { %v2657_v28 = vpop.eup %2656  ;;  %v1936_v32 = vadd.f32 1.0, %v2655_v7  ;;  %v1843_v51 = vsub.f32 0.0, %v1811_v4  ;;  %v1894_v53 = vmul.f32 1.442695, %v1842_v50 }
 0x3b7   : > { %v2659_v10 = vpop.eup %2658  ;;  %v1934_v52 = vadd.f32 1.0, %v2657_v28  ;;  %2662 = vpow2.f32 %v1898_v26  ;;  %v1900_v54 = vmul.f32 1.442695, %v1845_v58 }
 0x3b8   : > { %v2661_v36 = vpop.eup %2660  ;;  %2664 = vrcp.f32 %v1936_v32  ;;  %v1937_v20 = vadd.f32 1.0, %v2659_v10  ;;  %v1896_v59 = vmul.f32 1.442695, %v1843_v51 }
 0x3b9   : > { %2666 = vrcp.f32 %v1934_v52  ;;  %v1935_v40 = vadd.f32 1.0, %v2661_v36 }
 0x3ba   : > { %2668 = vrcp.f32 %v1937_v20 }
 0x3bb   : > { %2670 = vrcp.f32 %v1935_v40 }
 0x3bc   : > { %2672 = vpow2.f32 %v1894_v53 }
 0x3bd   : > { %2674 = vpow2.f32 %v1900_v54 }
 0x3be   : > { %2676 = vpow2.f32 %v1896_v59 }
 0x3c0   : > { %v2334_v55 = vpop.f32.mrb[112].mxu1 }
 0x3c1   : > { %v2663_v56 = vpop.eup %2662  ;;  %v1816_v57 = vadd.f32 %v2334_v55, %v3370_v46  ;;  %v1752_v60 = vpop.f32.mrb[113].mxu1 }
 0x3c2   : > { %v2665_v61 = vpop.eup %2664  ;;  %v1940_v62 = vadd.f32 1.0, %v2663_v56  ;;  %v1814_v29 = vadd.f32 %v3370_v46, %v1752_v60  ;;  %v2335_v41 = vpop.f32.mrb[114].mxu1 }
 0x3c3   : > { %v2667_v42 = vpop.eup %2666  ;;  %2001 = vst.msk [vmem:[%s3384_s9 + $0x90] sm:$0xff] %vm1982_vm0, %v2665_v61  ;;  %v1848_v43 = vsub.f32 0.0, %v1816_v57  ;;  %v1817_v30 = vadd.f32 %v2335_v41, %v3370_v46  ;;  %v1755_v31 = vpop.f32.mrb[115].mxu1 }
 0x3c4   : > { %v2669_v63 = vpop.eup %2668  ;;  %1999 = vst.msk [vmem:[%s3384_s9 + $0x80] sm:$0xff] %vm1982_vm0, %v2667_v42  ;;  %2678 = vrcp.f32 %v1940_v62  ;;  %v1846_v0 = vsub.f32 0.0, %v1814_v29  ;;  %v1815_v1 = vadd.f32 %v3370_v46, %v1755_v31 }
 0x3c5   : > { %v2671_v2 = vpop.eup %2670  ;;  %2002 = vst.msk [vmem:[%s3384_s9 + $0x98] sm:$0xff] %vm1982_vm0, %v2669_v63  ;;  %v1906_v3 = vmul.f32 1.442695, %v1848_v43  ;;  %v1849_v5 = vsub.f32 0.0, %v1817_v30 }
 0x3c6   : > { %v2673_v6 = vpop.eup %2672  ;;  %2000 = vst.msk [vmem:[%s3384_s9 + $0x88] sm:$0xff] %vm1982_vm0, %v2671_v2  ;;  %v1902_v8 = vmul.f32 1.442695, %v1846_v0  ;;  %v1847_v9 = vsub.f32 0.0, %v1815_v1 }
 0x3c7   : > { %v2675_v11 = vpop.eup %2674  ;;  %v1938_v12 = vadd.f32 1.0, %v2673_v6  ;;  %2680 = vpow2.f32 %v1906_v3  ;;  %v1908_v33 = vmul.f32 1.442695, %v1849_v5 }
 0x3c8   : > { %v2677_v14 = vpop.eup %2676  ;;  %v1941_v13 = vadd.f32 1.0, %v2675_v11  ;;  %2682 = vpow2.f32 %v1902_v8  ;;  %v1904_v35 = vmul.f32 1.442695, %v1847_v9 }
 0x3c9   : > { %2684 = vrcp.f32 %v1938_v12  ;;  %v1939_v34 = vadd.f32 1.0, %v2677_v14 }
 0x3ca   : > { %2686 = vrcp.f32 %v1941_v13 }
 0x3cb   : > { %2688 = vrcp.f32 %v1939_v34 }
 0x3cc   : > { %2690 = vpow2.f32 %v1908_v33 }
 0x3cd   : > { %2692 = vpow2.f32 %v1904_v35 }
 0x3ce   : > { %v2679_v15 = vpop.eup %2678 }
 0x3cf   : > { %2005 = vst.msk [vmem:[%s3384_s9 + $0xb0] sm:$0xff] %vm1982_vm0, %v2679_v15 }
 0x3d0   : > { %v2338_v16 = vpop.f32.mrb[116].mxu1 }
 0x3d1   : > { %v2681_v17 = vpop.eup %2680  ;;  %v1820_v18 = vadd.f32 %v2338_v16, %v3370_v46  ;;  %v1768_v19 = vpop.f32.mrb[117].mxu1 }
 0x3d2   : > { %v2683_v23 = vpop.eup %2682  ;;  %v1944_v25 = vadd.f32 1.0, %v2681_v17  ;;  %v1818_v27 = vadd.f32 %v3370_v46, %v1768_v19  ;;  %v2339_v44 = vpop.f32.mrb[118].mxu1 }
 0x3d3   : > { %v2685_v47 = vpop.eup %2684  ;;  %v1942_v21 = vadd.f32 1.0, %v2683_v23  ;;  %v1852_v22 = vsub.f32 0.0, %v1820_v18  ;;  %v1821_v37 = vadd.f32 %v2339_v44, %v3370_v46  ;;  %v1771_v38 = vpop.f32.mrb[119].mxu1 }
 0x3d4   : > { %v2687_v39 = vpop.eup %2686  ;;  %2003 = vst.msk [vmem:[%s3384_s9 + $0xa0] sm:$0xff] %vm1982_vm0, %v2685_v47  ;;  %2694 = vrcp.f32 %v1944_v25  ;;  %v1850_v24 = vsub.f32 0.0, %v1818_v27  ;;  %v1819_v48 = vadd.f32 %v3370_v46, %v1771_v38 }
 0x3d5   : > { %v2689_v49 = vpop.eup %2688  ;;  %2006 = vst.msk [vmem:[%s3384_s9 + $0xb8] sm:$0xff] %vm1982_vm0, %v2687_v39  ;;  %2696 = vrcp.f32 %v1942_v21  ;;  %v1914_v45 = vmul.f32 1.442695, %v1852_v22  ;;  %v1853_v50 = vsub.f32 0.0, %v1821_v37 }
 0x3d6   : > { %v2691_v4 = vpop.eup %2690  ;;  %2004 = vst.msk [vmem:[%s3384_s9 + $0xa8] sm:$0xff] %vm1982_vm0, %v2689_v49  ;;  %v1910_v7 = vmul.f32 1.442695, %v1850_v24  ;;  %v1851_v26 = vsub.f32 0.0, %v1819_v48 }
 0x3d7   : > { %v2693_v58 = vpop.eup %2692  ;;  %v1945_v28 = vadd.f32 1.0, %v2691_v4  ;;  %2698 = vpow2.f32 %v1914_v45  ;;  %v1916_v32 = vmul.f32 1.442695, %v1853_v50 }
 0x3d8   : > { %v1943_v51 = vadd.f32 1.0, %v2693_v58  ;;  %2700 = vpow2.f32 %v1910_v7  ;;  %v1912_v46 = vmul.f32 1.442695, %v1851_v26 }
 0x3d9   : > { %2702 = vrcp.f32 %v1945_v28 }
 0x3da   : > { %2704 = vrcp.f32 %v1943_v51 }
 0x3db   : > { %2706 = vpow2.f32 %v1916_v32 }
 0x3dc   : > { %2708 = vpow2.f32 %v1912_v46 }
 0x3de   : > { %v2695_v10 = vpop.eup %2694 }
 0x3df   : > { %v2697_v52 = vpop.eup %2696  ;;  %2009 = vst.msk [vmem:[%s3384_s9 + $0xd0] sm:$0xff] %vm1982_vm0, %v2695_v10 }
 0x3e0   : > { %2007 = vst.msk [vmem:[%s3384_s9 + $0xc0] sm:$0xff] %vm1982_vm0, %v2697_v52 }
 0x3e1   : > { %v2699_v36 = vpop.eup %2698 }
 0x3e2   : > { %v2701_v20 = vpop.eup %2700  ;;  %v1948_v53 = vadd.f32 1.0, %v2699_v36 }
 0x3e3   : > { %v2703_v40 = vpop.eup %2702  ;;  %v1946_v54 = vadd.f32 1.0, %v2701_v20 }
 0x3e4   : > { %v2705_v59 = vpop.eup %2704  ;;  %2010 = vst.msk [vmem:[%s3384_s9 + $0xd8] sm:$0xff] %vm1982_vm0, %v2703_v40  ;;  %2710 = vrcp.f32 %v1948_v53 }
 0x3e5   : > { %v2707_v55 = vpop.eup %2706  ;;  %2008 = vst.msk [vmem:[%s3384_s9 + $0xc8] sm:$0xff] %vm1982_vm0, %v2705_v59  ;;  %2712 = vrcp.f32 %v1946_v54 }
 0x3e6   : > { %v2709_v56 = vpop.eup %2708  ;;  %v1949_v57 = vadd.f32 1.0, %v2707_v55 }
 0x3e7   : > { %v1947_v60 = vadd.f32 1.0, %v2709_v56 }
 0x3e8   : > { %2714 = vrcp.f32 %v1949_v57 }
 0x3e9   : > { %2716 = vrcp.f32 %v1947_v60 }
 0x3ee   : > { %v2711_v61 = vpop.eup %2710 }
 0x3ef   : > { %v2713_v62 = vpop.eup %2712  ;;  %2013 = vst.msk [vmem:[%s3384_s9 + $0xf0] sm:$0xff] %vm1982_vm0, %v2711_v61 }
 0x3f0   : > { %2011 = vst.msk [vmem:[%s3384_s9 + $0xe0] sm:$0xff] %vm1982_vm0, %v2713_v62 }
 0x3f2   : > { %v2715_v29 = vpop.eup %2714 }
 0x3f3   : > { %v2717_v41 = vpop.eup %2716  ;;  %2014 = vst.msk [vmem:[%s3384_s9 + $0xf8] sm:$0xff] %vm1982_vm0, %v2715_v29 }
 0x3f4   : > { %2012 = vst.msk [vmem:[%s3384_s9 + $0xe8] sm:$0xff] %vm1982_vm0, %v2717_v41 }
 0x3f5 PF: > { %s19_s26 = sadd.s32 1, %s2724_s26  }
 0x3f6   : > { %p16_p4 = scmp.ge.s32.totalorder %s19_s26, 4  }
 0x3f8   :  { %18 = sbr.rel (!%p16_p4) target bundleno = 3 (0x3), region = 78 }

</bundles_post_ra>
